<compile_context>
chip_gen: v7x
topology: tpu7x:2x2x1
jax: 0.10.0
libtpu: 0.0.40
codegen_flags: <defaults>
</compile_context>

<pallas_src>
import functools

import jax
import jax.numpy as jnp
from jax.experimental import pallas as pl
from jax.experimental.pallas import tpu as pltpu

EPS = 1e-5
LANE = 128
_VMEM_LIMIT = 48 * 1024 * 1024  # explicit scoped VMEM limit


def _round_up(x, m):
    return (x + m - 1) // m * m


def _pick_tile_m(m, *chans):
    """Largest row tile that fits a conservative double-buffered VMEM budget."""
    budget = 16 * 1024 * 1024
    # bf16 input row + f32 output row per channel block (x2 for double buffer)
    per_row = sum(2 * c + 4 * c for c in chans) * 2
    for t in (1024, 512, 256, 128, 64, 32, 16, 8):
        if t <= max(m, 8) and t * per_row <= budget:
            return t
    return 8


def _cparams():
    return pltpu.CompilerParams(dimension_semantics=("parallel",),
                                vmem_limit_bytes=_VMEM_LIMIT)


# ----------------------------------------------------------------------------
# Kernels
# ----------------------------------------------------------------------------
def _gemm_stats_kernel(x_ref, w_ref, y_ref, s_ref):
    """y = x @ w (bf16 in, f32 acc); s = per-tile [sum, sum_sq] over rows."""
    acc = jnp.dot(x_ref[...], w_ref[...], preferred_element_type=jnp.float32)
    y_ref[...] = acc
    s_ref[0] = jnp.concatenate(
        [jnp.sum(acc, axis=0, keepdims=True),
         jnp.sum(acc * acc, axis=0, keepdims=True)], axis=0)


def _bnrelu_gemm_stats_kernel(m_valid, x_ref, sc_ref, sh_ref, w_ref,
                              y_ref, s_ref):
    """a = relu(scale*x + shift) (prev-layer BN fused); y = a @ w; stats."""
    tm = x_ref.shape[0]
    a = jnp.maximum(x_ref[...] * sc_ref[...] + sh_ref[...], 0.0)
    # Zero out rows beyond the valid range so padded rows never pollute stats.
    row = pl.program_id(0) * tm + jax.lax.broadcasted_iota(
        jnp.int32, (tm, 1), 0)
    a = jnp.where(row < m_valid, a, 0.0).astype(jnp.bfloat16)
    acc = jnp.dot(a, w_ref[...], preferred_element_type=jnp.float32)
    y_ref[...] = acc
    s_ref[0] = jnp.concatenate(
        [jnp.sum(acc, axis=0, keepdims=True),
         jnp.sum(acc * acc, axis=0, keepdims=True)], axis=0)


def _bnrelu_conv3x3_stats_kernel(x_ref, sc_ref, sh_ref, w_ref,
                                 y_ref, s_ref, pad_ref):
    """One image per grid step: a = relu(scale*x + shift); zero-pad into VMEM
    scratch; build 9 shifted views; single wide-contraction GEMM; stats."""
    _, h, w, c = x_ref.shape
    a = x_ref[0]                                         # (h, w, c) f32
    sc = sc_ref[...].reshape(1, 1, c)
    sh = sh_ref[...].reshape(1, 1, c)
    a = jnp.maximum(a * sc + sh, 0.0).astype(jnp.bfloat16)
    pad_ref[...] = jnp.zeros_like(pad_ref)               # (h+2, w+2, c)
    pad_ref[1:h + 1, 1:w + 1, :] = a
    cols = [pad_ref[di:di + h, dj:dj + w, :].reshape(h * w, c)
            for di in range(3) for dj in range(3)]
    xcat = jnp.concatenate(cols, axis=-1)                # (h*w, 9c) bf16
    acc = jnp.dot(xcat, w_ref[...], preferred_element_type=jnp.float32)
    y_ref[0] = acc
    s_ref[0] = jnp.concatenate(
        [jnp.sum(acc, axis=0, keepdims=True),
         jnp.sum(acc * acc, axis=0, keepdims=True)], axis=0)


def _bn_add_relu_kernel(y_ref, sc_ref, sh_ref, id_ref, o_ref):
    """out = relu(scale*y + shift + identity)  (final bn3 + residual)."""
    o_ref[...] = jnp.maximum(
        y_ref[...] * sc_ref[...] + sh_ref[...] + id_ref[...], 0.0)


# ----------------------------------------------------------------------------
# pallas_call wrappers
# ----------------------------------------------------------------------------
def _gemm_stats(x, w, tm):
    m_p, cin = x.shape
    cout = w.shape[1]
    grid = (m_p // tm,)
    return pl.pallas_call(
        _gemm_stats_kernel,
        grid=grid,
        in_specs=[pl.BlockSpec((tm, cin), lambda i: (i, 0)),
                  pl.BlockSpec((cin, cout), lambda i: (0, 0))],
        out_specs=[pl.BlockSpec((tm, cout), lambda i: (i, 0)),
                   pl.BlockSpec((1, 2, cout), lambda i: (i, 0, 0))],
        out_shape=[jax.ShapeDtypeStruct((m_p, cout), jnp.float32),
                   jax.ShapeDtypeStruct((grid[0], 2, cout), jnp.float32)],
        compiler_params=_cparams(),
        cost_estimate=pl.CostEstimate(
            flops=2 * m_p * cin * cout, transcendentals=0,
            bytes_accessed=2 * (m_p * cin + cin * cout) + 4 * m_p * cout),
    )(x, w)


def _bnrelu_gemm_stats(x, sc, sh, w, tm, m_valid):
    m_p, cin = x.shape
    cout = w.shape[1]
    grid = (m_p // tm,)
    kernel = functools.partial(_bnrelu_gemm_stats_kernel, m_valid)
    return pl.pallas_call(
        kernel,
        grid=grid,
        in_specs=[pl.BlockSpec((tm, cin), lambda i: (i, 0)),
                  pl.BlockSpec((1, cin), lambda i: (0, 0)),
                  pl.BlockSpec((1, cin), lambda i: (0, 0)),
                  pl.BlockSpec((cin, cout), lambda i: (0, 0))],
        out_specs=[pl.BlockSpec((tm, cout), lambda i: (i, 0)),
                   pl.BlockSpec((1, 2, cout), lambda i: (i, 0, 0))],
        out_shape=[jax.ShapeDtypeStruct((m_p, cout), jnp.float32),
                   jax.ShapeDtypeStruct((grid[0], 2, cout), jnp.float32)],
        compiler_params=_cparams(),
        cost_estimate=pl.CostEstimate(
            flops=2 * m_p * cin * cout, transcendentals=0,
            bytes_accessed=4 * m_p * cin + 2 * cin * cout + 4 * m_p * cout),
    )(x, sc, sh, w)


def _bnrelu_conv3x3_stats(x_img, sc, sh, w2):
    n, h, w, c = x_img.shape
    cout = w2.shape[1]
    return pl.pallas_call(
        _bnrelu_conv3x3_stats_kernel,
        grid=(n,),
        in_specs=[pl.BlockSpec((1, h, w, c), lambda i: (i, 0, 0, 0)),
                  pl.BlockSpec((1, c), lambda i: (0, 0)),
                  pl.BlockSpec((1, c), lambda i: (0, 0)),
                  pl.BlockSpec((9 * c, cout), lambda i: (0, 0))],
        out_specs=[pl.BlockSpec((1, h * w, cout), lambda i: (i, 0, 0)),
                   pl.BlockSpec((1, 2, cout), lambda i: (i, 0, 0))],
        out_shape=[jax.ShapeDtypeStruct((n, h * w, cout), jnp.float32),
                   jax.ShapeDtypeStruct((n, 2, cout), jnp.float32)],
        scratch_shapes=[pltpu.VMEM((h + 2, w + 2, c), jnp.bfloat16)],
        compiler_params=_cparams(),
        cost_estimate=pl.CostEstimate(
            flops=2 * n * h * w * 9 * c * cout, transcendentals=0,
            bytes_accessed=4 * n * h * w * c + 2 * 9 * c * cout
            + 4 * n * h * w * cout),
    )(x_img, sc, sh, w2)


def _bn_add_relu(y, sc, sh, ident, tm):
    m_p, c = y.shape
    grid = (m_p // tm,)
    return pl.pallas_call(
        _bn_add_relu_kernel,
        grid=grid,
        in_specs=[pl.BlockSpec((tm, c), lambda i: (i, 0)),
                  pl.BlockSpec((1, c), lambda i: (0, 0)),
                  pl.BlockSpec((1, c), lambda i: (0, 0)),
                  pl.BlockSpec((tm, c), lambda i: (i, 0))],
        out_specs=pl.BlockSpec((tm, c), lambda i: (i, 0)),
        out_shape=jax.ShapeDtypeStruct((m_p, c), jnp.float32),
        compiler_params=_cparams(),
        cost_estimate=pl.CostEstimate(
            flops=3 * m_p * c, transcendentals=0,
            bytes_accessed=12 * m_p * c),
    )(y, sc, sh, ident)


# ----------------------------------------------------------------------------
# Glue
# ----------------------------------------------------------------------------
def _pad2d(a, rows, cols):
    return jnp.pad(a, ((0, rows - a.shape[0]), (0, cols - a.shape[1])))


def _bn_coeffs(stats, count, gamma, beta, cpad):
    """Reduce per-tile (sum, sum_sq) partials -> per-channel scale/shift."""
    s = jnp.sum(stats, axis=0)                      # (2, cpad)
    mean = s[0] / count
    var = jnp.maximum(s[1] / count - mean * mean, 0.0)
    g = jnp.pad(gamma.astype(jnp.float32), (0, cpad - gamma.shape[0]))
    b = jnp.pad(beta.astype(jnp.float32), (0, cpad - beta.shape[0]))
    scale = g * jax.lax.rsqrt(var + EPS)
    shift = b - mean * scale
    return scale.reshape(1, cpad), shift.reshape(1, cpad)


@jax.jit
def bottleneck_forward(x_nchw, params):
    x = jnp.transpose(x_nchw, (0, 2, 3, 1)).astype(jnp.float32)   # -> NHWC
    n, h, w, cin = x.shape
    width = params["conv1_w"].shape[0]
    out_ch = params["conv3_w"].shape[0]
    # Residual without a downsample branch requires matching channels.
    assert cin == out_ch, "downsample branch not implemented"
    m = n * h * w
    cin_p = _round_up(cin, LANE)
    wd_p = _round_up(width, LANE)
    co_p = _round_up(out_ch, LANE)
    tm = _pick_tile_m(m, max(cin_p, wd_p, co_p), max(wd_p, co_p))
    m_p = _round_up(m, tm)

    x2 = x.reshape(m, cin)

    # ---- conv1 (1x1) + bn1 stats ------------------------------------------
    w1 = _pad2d(params["conv1_w"][:, :, 0, 0].T, cin_p, wd_p).astype(
        jnp.bfloat16)
    x1 = _pad2d(x2, m_p, cin_p).astype(jnp.bfloat16)
    y1, s1 = _gemm_stats(x1, w1, tm)
    sc1, sh1 = _bn_coeffs(s1, m, params["bn1_g"], params["bn1_b"], wd_p)

    # ---- bn1+relu fused into conv2 (3x3, pad=1) + bn2 stats ----------------
    y1_img = y1[:m].reshape(n, h, w, wd_p)
    w2 = jnp.transpose(params["conv2_w"], (2, 3, 1, 0))           # (3,3,ci,co)
    w2 = jnp.pad(w2, ((0, 0), (0, 0), (0, wd_p - width), (0, wd_p - width)))
    w2 = w2.reshape(9 * wd_p, wd_p).astype(jnp.bfloat16)
    y2, s2 = _bnrelu_conv3x3_stats(y1_img, sc1, sh1, w2)
    sc2, sh2 = _bn_coeffs(s2, m, params["bn2_g"], params["bn2_b"], wd_p)

    # ---- bn2+relu fused into conv3 (1x1) + bn3 stats -----------------------
    y2f = jnp.pad(y2.reshape(m, wd_p), ((0, m_p - m), (0, 0)))
    w3 = _pad2d(params["conv3_w"][:, :, 0, 0].T, wd_p, co_p).astype(
        jnp.bfloat16)
    y3, s3 = _bnrelu_gemm_stats(y2f, sc2, sh2, w3, tm, m)
    sc3, sh3 = _bn_coeffs(s3, m, params["bn3_g"], params["bn3_b"], co_p)

    # ---- bn3 + residual add + relu -----------------------------------------
    ident = _pad2d(x2, m_p, co_p)
    out = _bn_add_relu(y3, sc3, sh3, ident, tm)
    out = out[:m, :out_ch].reshape(n, h, w, out_ch)
    return jnp.transpose(out, (0, 3, 1, 2))                       # -> NCHW


# ----------------------------------------------------------------------------
# Pure-JAX reference (conv operands rounded to bf16 to mirror the kernel)
# ----------------------------------------------------------------------------
def _bn_train(y, g, b):
    mean = jnp.mean(y, axis=(0, 1, 2), keepdims=True)
    var = jnp.mean((y - mean) ** 2, axis=(0, 1, 2), keepdims=True)
    return g.reshape(1, 1, 1, -1) * (y - mean) * jax.lax.rsqrt(var + EPS) \
        + b.reshape(1, 1, 1, -1)


def reference_forward(x_nchw, params):
    x = jnp.transpose(x_nchw, (0, 2, 3, 1)).astype(jnp.float32)
    dn = ("NHWC", "HWIO", "NHWC")

    def conv(inp, w_oihw, pad):
        wt = jnp.transpose(w_oihw, (2, 3, 1, 0))
        inp = inp.astype(jnp.bfloat16).astype(jnp.float32)
        wt = wt.astype(jnp.bfloat16).astype(jnp.float32)
        return jax.lax.conv_general_dilated(inp, wt, (1, 1), pad,
                                            dimension_numbers=dn)

    out = jax.nn.relu(_bn_train(conv(x, params["conv1_w"], "VALID"),
                                params["bn1_g"], params["bn1_b"]))
    out = jax.nn.relu(_bn_train(conv(out, params["conv2_w"],
                                     ((1, 1), (1, 1))),
                                params["bn2_g"], params["bn2_b"]))
    out = _bn_train(conv(out, params["conv3_w"], "VALID"),
                    params["bn3_g"], params["bn3_b"])
    out = jax.nn.relu(out + x)
    return jnp.transpose(out, (0, 3, 1, 2))


# ----------------------------------------------------------------------------
def init_params(key, inplanes, planes, expansion=4, base_width=64, groups=1):
    width = int(planes * (base_width / 64.0)) * groups
    out_ch = planes * expansion
    ks = jax.random.split(key, 9)
    return {
        "conv1_w": 0.2 * jax.random.normal(ks[0], (width, inplanes, 1, 1),
                                           jnp.float32),
        "conv2_w": 0.2 * jax.random.normal(ks[1], (width, width, 3, 3),
                                           jnp.float32),
        "conv3_w": 0.2 * jax.random.normal(ks[2], (out_ch, width, 1, 1),
                                           jnp.float32),
        "bn1_g": 1.0 + 0.1 * jax.random.normal(ks[3], (width,), jnp.float32),
        "bn1_b": 0.1 * jax.random.normal(ks[4], (width,), jnp.float32),
        "bn2_g": 1.0 + 0.1 * jax.random.normal(ks[5], (width,), jnp.float32),
        "bn2_b": 0.1 * jax.random.normal(ks[6], (width,), jnp.float32),
        "bn3_g": 1.0 + 0.1 * jax.random.normal(ks[7], (out_ch,), jnp.float32),
        "bn3_b": 0.1 * jax.random.normal(ks[8], (out_ch,), jnp.float32),
    }


if __name__ == "__main__":
    key = jax.random.PRNGKey(0)
    k_x, k_p = jax.random.split(key)

    # Bottleneck(inplanes=16, planes=4) -> width=4, out_ch=16, stride=1,
    # downsample=None (residual add shape-consistent).
    N, INPLANES, PLANES, H, W = 2, 16, 4, 8, 8
    params = init_params(k_p, INPLANES, PLANES)
    x = jax.random.normal(k_x, (N, INPLANES, H, W), jnp.float32)  # NCHW

    y = jax.block_until_ready(bottleneck_forward(x, params))
    assert y.shape == (N, PLANES * 4, H, W), y.shape

    y_ref = reference_forward(x, params)
    assert jnp.allclose(y, y_ref, rtol=1e-2, atol=1e-2), \
        float(jnp.max(jnp.abs(y - y_ref)))

    print("KERNEL_OK")
</pallas_src>

<mosaic_0001>
module attributes {stable_mosaic.version = 11 : i64} {
  func.func @_gemm_stats_kernel(%arg0: i32, %arg1: memref<128x128xbf16, #tpu.memory_space<vmem>>, %arg2: memref<128x128xbf16, #tpu.memory_space<vmem>>, %arg3: memref<128x128xf32, #tpu.memory_space<vmem>>, %arg4: memref<1x2x128xf32, #tpu.memory_space<vmem>>) attributes {dimension_semantics = [#tpu.dimension_semantics<parallel>], iteration_bounds = array<i64: 1>, scalar_prefetch = 0 : i64, scratch_operands = 0 : i64, tpu.core_type = #tpu.core_type<tc>, window_params = [{transform_indices = @transform_0, window_bounds = array<i64: 128, 128>}, {pipeline_mode = #tpu.pipeline_mode<synchronous>, transform_indices = @transform_1, window_bounds = array<i64: 128, 128>}, {transform_indices = @transform_2, window_bounds = array<i64: 128, 128>}, {transform_indices = @transform_3, window_bounds = array<i64: 1, 2, 128>}]} {
    %c0 = arith.constant 0 : index
    %c0_0 = arith.constant 0 : index
    %0 = vector.load %arg1[%c0, %c0_0] : memref<128x128xbf16, #tpu.memory_space<vmem>>, vector<128x128xbf16>
    %c0_1 = arith.constant 0 : index
    %c0_2 = arith.constant 0 : index
    %1 = vector.load %arg2[%c0_1, %c0_2] : memref<128x128xbf16, #tpu.memory_space<vmem>>, vector<128x128xbf16>
    %cst = arith.constant dense<0.000000e+00> : vector<128x128xf32>
    %2 = tpu.matmul %0, %1, %cst {dimension_numbers = #tpu.dot_dimension_numbers<[1], [0], [0], [1], [0, 0, 1, 1], [], []>} : vector<128x128xbf16>, vector<128x128xbf16>, vector<128x128xf32> -> vector<128x128xf32>
    %c0_3 = arith.constant 0 : index
    %c0_4 = arith.constant 0 : index
    %3 = vector.load %arg3[%c0_3, %c0_4] : memref<128x128xf32, #tpu.memory_space<vmem>>, vector<128x128xf32>
    tpu.vector_store %arg3[%c0_3, %c0_4], %2 {strides = array<i32>} : memref<128x128xf32, #tpu.memory_space<vmem>>, vector<128x128xf32>,
    %cst_5 = arith.constant dense<0.000000e+00> : vector<128xf32>
    %4 = vector.multi_reduction <add>, %2, %cst_5 [0] : vector<128x128xf32> to vector<128xf32>
    %5 = vector.shape_cast %4 : vector<128xf32> to vector<1x128xf32>
    %6 = arith.mulf %2, %2 : vector<128x128xf32>
    %cst_6 = arith.constant dense<0.000000e+00> : vector<128xf32>
    %7 = vector.multi_reduction <add>, %6, %cst_6 [0] : vector<128x128xf32> to vector<128xf32>
    %8 = vector.shape_cast %7 : vector<128xf32> to vector<1x128xf32>
    %9 = tpu.concatenate %5, %8 in 0 : vector<1x128xf32>, vector<1x128xf32> -> vector<2x128xf32>
    %c0_7 = arith.constant 0 : index
    %c0_8 = arith.constant 0 : index
    %c0_9 = arith.constant 0 : index
    %10 = vector.load %arg4[%c0_7, %c0_8, %c0_9] : memref<1x2x128xf32, #tpu.memory_space<vmem>>, vector<1x2x128xf32>
    %11 = vector.shape_cast %10 : vector<1x2x128xf32> to vector<2x128xf32>
    %12 = vector.shape_cast %9 : vector<2x128xf32> to vector<1x2x128xf32>
    tpu.vector_store %arg4[%c0_7, %c0_8, %c0_9], %12 {strides = array<i32>} : memref<1x2x128xf32, #tpu.memory_space<vmem>>, vector<1x2x128xf32>,
    return
  }
  func.func @transform_0(%arg0: i32) -> (i32, i32) {
    %c0_i32 = arith.constant 0 : i32
    %c0_i32_0 = arith.constant 0 : i32
    return %arg0, %c0_i32 : i32, i32
  }
  func.func @transform_1(%arg0: i32) -> (i32, i32) {
    %c0_i32 = arith.constant 0 : i32
    %c0_i32_0 = arith.constant 0 : i32
    %c0_i32_1 = arith.constant 0 : i32
    return %c0_i32, %c0_i32_0 : i32, i32
  }
  func.func @transform_2(%arg0: i32) -> (i32, i32) {
    %c0_i32 = arith.constant 0 : i32
    %c0_i32_0 = arith.constant 0 : i32
    return %arg0, %c0_i32 : i32, i32
  }
  func.func @transform_3(%arg0: i32) -> (i32, i32, i32) {
    %c0_i32 = arith.constant 0 : i32
    %c0_i32_0 = arith.constant 0 : i32
    %c0_i32_1 = arith.constant 0 : i32
    return %arg0, %c0_i32, %c0_i32_0 : i32, i32, i32
  }
}

module attributes {stable_mosaic.version = 11 : i64} {
  func.func @_bnrelu_conv3x3_stats_kernel(%arg0: i32, %arg1: memref<1x8x8x128xf32, #tpu.memory_space<vmem>>, %arg2: memref<1x128xf32, #tpu.memory_space<vmem>>, %arg3: memref<1x128xf32, #tpu.memory_space<vmem>>, %arg4: memref<1152x128xbf16, #tpu.memory_space<vmem>>, %arg5: memref<1x64x128xf32, #tpu.memory_space<vmem>>, %arg6: memref<1x2x128xf32, #tpu.memory_space<vmem>>, %arg7: memref<10x10x128xbf16, #tpu.memory_space<vmem>>) attributes {dimension_semantics = [#tpu.dimension_semantics<parallel>], iteration_bounds = array<i64: 2>, scalar_prefetch = 0 : i64, scratch_operands = 1 : i64, tpu.core_type = #tpu.core_type<tc>, window_params = [{transform_indices = @transform_0, window_bounds = array<i64: 1, 8, 8, 128>}, {pipeline_mode = #tpu.pipeline_mode<synchronous>, transform_indices = @transform_1, window_bounds = array<i64: 1, 128>}, {pipeline_mode = #tpu.pipeline_mode<synchronous>, transform_indices = @transform_2, window_bounds = array<i64: 1, 128>}, {pipeline_mode = #tpu.pipeline_mode<synchronous>, transform_indices = @transform_3, window_bounds = array<i64: 1152, 128>}, {transform_indices = @transform_4, window_bounds = array<i64: 1, 64, 128>}, {transform_indices = @transform_5, window_bounds = array<i64: 1, 2, 128>}]} {
    %c0 = arith.constant 0 : index
    %c0_0 = arith.constant 0 : index
    %c0_1 = arith.constant 0 : index
    %c0_2 = arith.constant 0 : index
    %0 = vector.load %arg1[%c0, %c0_0, %c0_1, %c0_2] : memref<1x8x8x128xf32, #tpu.memory_space<vmem>>, vector<1x8x8x128xf32>
    %1 = vector.shape_cast %0 : vector<1x8x8x128xf32> to vector<8x8x128xf32>
    %c0_3 = arith.constant 0 : index
    %c0_4 = arith.constant 0 : index
    %2 = vector.load %arg2[%c0_3, %c0_4] : memref<1x128xf32, #tpu.memory_space<vmem>>, vector<1x128xf32>
    %3 = vector.shape_cast %2 : vector<1x128xf32> to vector<1x1x128xf32>
    %c0_5 = arith.constant 0 : index
    %c0_6 = arith.constant 0 : index
    %4 = vector.load %arg3[%c0_5, %c0_6] : memref<1x128xf32, #tpu.memory_space<vmem>>, vector<1x128xf32>
    %5 = vector.shape_cast %4 : vector<1x128xf32> to vector<1x1x128xf32>
    %6 = vector.broadcast %3 : vector<1x1x128xf32> to vector<8x8x128xf32>
    %7 = arith.mulf %1, %6 : vector<8x8x128xf32>
    %8 = vector.broadcast %5 : vector<1x1x128xf32> to vector<8x8x128xf32>
    %9 = arith.addf %7, %8 : vector<8x8x128xf32>
    %cst = arith.constant 0.000000e+00 : f32
    %10 = vector.broadcast %cst : f32 to vector<8x8x128xf32>
    %11 = arith.maximumf %9, %10 : vector<8x8x128xf32>
    %12 = arith.truncf %11 : vector<8x8x128xf32> to vector<8x8x128xbf16>
    %cst_7 = arith.constant 0.000000e+00 : bf16
    %13 = vector.broadcast %cst_7 : bf16 to vector<10x10x128xbf16>
    %c0_8 = arith.constant 0 : index
    %c0_9 = arith.constant 0 : index
    %c0_10 = arith.constant 0 : index
    %14 = vector.load %arg7[%c0_8, %c0_9, %c0_10] : memref<10x10x128xbf16, #tpu.memory_space<vmem>>, vector<10x10x128xbf16>
    tpu.vector_store %arg7[%c0_8, %c0_9, %c0_10], %13 {strides = array<i32>} : memref<10x10x128xbf16, #tpu.memory_space<vmem>>, vector<10x10x128xbf16>,
    %c1 = arith.constant 1 : index
    %c1_11 = arith.constant 1 : index
    %c0_12 = arith.constant 0 : index
    %15 = vector.load %arg7[%c1, %c1_11, %c0_12] : memref<10x10x128xbf16, #tpu.memory_space<vmem>>, vector<8x8x128xbf16>
    tpu.vector_store %arg7[%c1, %c1_11, %c0_12], %12 {strides = array<i32>} : memref<10x10x128xbf16, #tpu.memory_space<vmem>>, vector<8x8x128xbf16>,
    %c0_13 = arith.constant 0 : index
    %c0_14 = arith.constant 0 : index
    %c0_15 = arith.constant 0 : index
    %16 = vector.load %arg7[%c0_13, %c0_14, %c0_15] : memref<10x10x128xbf16, #tpu.memory_space<vmem>>, vector<8x8x128xbf16>
    %17 = vector.shape_cast %16 : vector<8x8x128xbf16> to vector<64x128xbf16>
    %c0_16 = arith.constant 0 : index
    %c1_17 = arith.constant 1 : index
    %c0_18 = arith.constant 0 : index
    %18 = vector.load %arg7[%c0_16, %c1_17, %c0_18] : memref<10x10x128xbf16, #tpu.memory_space<vmem>>, vector<8x8x128xbf16>
    %19 = vector.shape_cast %18 : vector<8x8x128xbf16> to vector<64x128xbf16>
    %c0_19 = arith.constant 0 : index
    %c2 = arith.constant 2 : index
    %c0_20 = arith.constant 0 : index
    %20 = vector.load %arg7[%c0_19, %c2, %c0_20] : memref<10x10x128xbf16, #tpu.memory_space<vmem>>, vector<8x8x128xbf16>
    %21 = vector.shape_cast %20 : vector<8x8x128xbf16> to vector<64x128xbf16>
    %c1_21 = arith.constant 1 : index
    %c0_22 = arith.constant 0 : index
    %c0_23 = arith.constant 0 : index
    %22 = vector.load %arg7[%c1_21, %c0_22, %c0_23] : memref<10x10x128xbf16, #tpu.memory_space<vmem>>, vector<8x8x128xbf16>
    %23 = vector.shape_cast %22 : vector<8x8x128xbf16> to vector<64x128xbf16>
    %c1_24 = arith.constant 1 : index
    %c1_25 = arith.constant 1 : index
    %c0_26 = arith.constant 0 : index
    %24 = vector.load %arg7[%c1_24, %c1_25, %c0_26] : memref<10x10x128xbf16, #tpu.memory_space<vmem>>, vector<8x8x128xbf16>
    %25 = vector.shape_cast %24 : vector<8x8x128xbf16> to vector<64x128xbf16>
    %c1_27 = arith.constant 1 : index
    %c2_28 = arith.constant 2 : index
    %c0_29 = arith.constant 0 : index
    %26 = vector.load %arg7[%c1_27, %c2_28, %c0_29] : memref<10x10x128xbf16, #tpu.memory_space<vmem>>, vector<8x8x128xbf16>
    %27 = vector.shape_cast %26 : vector<8x8x128xbf16> to vector<64x128xbf16>
    %c2_30 = arith.constant 2 : index
    %c0_31 = arith.constant 0 : index
    %c0_32 = arith.constant 0 : index
    %28 = vector.load %arg7[%c2_30, %c0_31, %c0_32] : memref<10x10x128xbf16, #tpu.memory_space<vmem>>, vector<8x8x128xbf16>
    %29 = vector.shape_cast %28 : vector<8x8x128xbf16> to vector<64x128xbf16>
    %c2_33 = arith.constant 2 : index
    %c1_34 = arith.constant 1 : index
    %c0_35 = arith.constant 0 : index
    %30 = vector.load %arg7[%c2_33, %c1_34, %c0_35] : memref<10x10x128xbf16, #tpu.memory_space<vmem>>, vector<8x8x128xbf16>
    %31 = vector.shape_cast %30 : vector<8x8x128xbf16> to vector<64x128xbf16>
    %c2_36 = arith.constant 2 : index
    %c2_37 = arith.constant 2 : index
    %c0_38 = arith.constant 0 : index
    %32 = vector.load %arg7[%c2_36, %c2_37, %c0_38] : memref<10x10x128xbf16, #tpu.memory_space<vmem>>, vector<8x8x128xbf16>
    %33 = vector.shape_cast %32 : vector<8x8x128xbf16> to vector<64x128xbf16>
    %34 = tpu.concatenate %17, %19, %21, %23, %25, %27, %29, %31, %33 in 1 : vector<64x128xbf16>, vector<64x128xbf16>, vector<64x128xbf16>, vector<64x128xbf16>, vector<64x128xbf16>, vector<64x128xbf16>, vector<64x128xbf16>, vector<64x128xbf16>, vector<64x128xbf16> -> vector<64x1152xbf16>
    %c0_39 = arith.constant 0 : index
    %c0_40 = arith.constant 0 : index
    %35 = vector.load %arg4[%c0_39, %c0_40] : memref<1152x128xbf16, #tpu.memory_space<vmem>>, vector<1152x128xbf16>
    %cst_41 = arith.constant dense<0.000000e+00> : vector<64x128xf32>
    %36 = tpu.matmul %34, %35, %cst_41 {dimension_numbers = #tpu.dot_dimension_numbers<[1], [0], [0], [1], [0, 0, 1, 1], [], []>} : vector<64x1152xbf16>, vector<1152x128xbf16>, vector<64x128xf32> -> vector<64x128xf32>
    %c0_42 = arith.constant 0 : index
    %c0_43 = arith.constant 0 : index
    %c0_44 = arith.constant 0 : index
    %37 = vector.load %arg5[%c0_42, %c0_43, %c0_44] : memref<1x64x128xf32, #tpu.memory_space<vmem>>, vector<1x64x128xf32>
    %38 = vector.shape_cast %37 : vector<1x64x128xf32> to vector<64x128xf32>
    %39 = vector.shape_cast %36 : vector<64x128xf32> to vector<1x64x128xf32>
    tpu.vector_store %arg5[%c0_42, %c0_43, %c0_44], %39 {strides = array<i32>} : memref<1x64x128xf32, #tpu.memory_space<vmem>>, vector<1x64x128xf32>,
    %cst_45 = arith.constant dense<0.000000e+00> : vector<128xf32>
    %40 = vector.multi_reduction <add>, %36, %cst_45 [0] : vector<64x128xf32> to vector<128xf32>
    %41 = vector.shape_cast %40 : vector<128xf32> to vector<1x128xf32>
    %42 = arith.mulf %36, %36 : vector<64x128xf32>
    %cst_46 = arith.constant dense<0.000000e+00> : vector<128xf32>
    %43 = vector.multi_reduction <add>, %42, %cst_46 [0] : vector<64x128xf32> to vector<128xf32>
    %44 = vector.shape_cast %43 : vector<128xf32> to vector<1x128xf32>
    %45 = tpu.concatenate %41, %44 in 0 : vector<1x128xf32>, vector<1x128xf32> -> vector<2x128xf32>
    %c0_47 = arith.constant 0 : index
    %c0_48 = arith.constant 0 : index
    %c0_49 = arith.constant 0 : index
    %46 = vector.load %arg6[%c0_47, %c0_48, %c0_49] : memref<1x2x128xf32, #tpu.memory_space<vmem>>, vector<1x2x128xf32>
    %47 = vector.shape_cast %46 : vector<1x2x128xf32> to vector<2x128xf32>
    %48 = vector.shape_cast %45 : vector<2x128xf32> to vector<1x2x128xf32>
    tpu.vector_store %arg6[%c0_47, %c0_48, %c0_49], %48 {strides = array<i32>} : memref<1x2x128xf32, #tpu.memory_space<vmem>>, vector<1x2x128xf32>,
    return
  }
  func.func @transform_0(%arg0: i32) -> (i32, i32, i32, i32) {
    %c0_i32 = arith.constant 0 : i32
    %c0_i32_0 = arith.constant 0 : i32
    %c0_i32_1 = arith.constant 0 : i32
    %c0_i32_2 = arith.constant 0 : i32
    return %arg0, %c0_i32, %c0_i32_0, %c0_i32_1 : i32, i32, i32, i32
  }
  func.func @transform_1(%arg0: i32) -> (i32, i32) {
    %c0_i32 = arith.constant 0 : i32
    %c0_i32_0 = arith.constant 0 : i32
    %c0_i32_1 = arith.constant 0 : i32
    return %c0_i32, %c0_i32_0 : i32, i32
  }
  func.func @transform_2(%arg0: i32) -> (i32, i32) {
    %c0_i32 = arith.constant 0 : i32
    %c0_i32_0 = arith.constant 0 : i32
    %c0_i32_1 = arith.constant 0 : i32
    return %c0_i32, %c0_i32_0 : i32, i32
  }
  func.func @transform_3(%arg0: i32) -> (i32, i32) {
    %c0_i32 = arith.constant 0 : i32
    %c0_i32_0 = arith.constant 0 : i32
    %c0_i32_1 = arith.constant 0 : i32
    return %c0_i32, %c0_i32_0 : i32, i32
  }
  func.func @transform_4(%arg0: i32) -> (i32, i32, i32) {
    %c0_i32 = arith.constant 0 : i32
    %c0_i32_0 = arith.constant 0 : i32
    %c0_i32_1 = arith.constant 0 : i32
    return %arg0, %c0_i32, %c0_i32_0 : i32, i32, i32
  }
  func.func @transform_5(%arg0: i32) -> (i32, i32, i32) {
    %c0_i32 = arith.constant 0 : i32
    %c0_i32_0 = arith.constant 0 : i32
    %c0_i32_1 = arith.constant 0 : i32
    return %arg0, %c0_i32, %c0_i32_0 : i32, i32, i32
  }
}

module attributes {stable_mosaic.version = 11 : i64} {
  func.func @_bnrelu_gemm_stats_kernel(%arg0: i32, %arg1: memref<128x128xf32, #tpu.memory_space<vmem>>, %arg2: memref<1x128xf32, #tpu.memory_space<vmem>>, %arg3: memref<1x128xf32, #tpu.memory_space<vmem>>, %arg4: memref<128x128xbf16, #tpu.memory_space<vmem>>, %arg5: memref<128x128xf32, #tpu.memory_space<vmem>>, %arg6: memref<1x2x128xf32, #tpu.memory_space<vmem>>) attributes {dimension_semantics = [#tpu.dimension_semantics<parallel>], iteration_bounds = array<i64: 1>, scalar_prefetch = 0 : i64, scratch_operands = 0 : i64, tpu.core_type = #tpu.core_type<tc>, window_params = [{transform_indices = @transform_0, window_bounds = array<i64: 128, 128>}, {pipeline_mode = #tpu.pipeline_mode<synchronous>, transform_indices = @transform_1, window_bounds = array<i64: 1, 128>}, {pipeline_mode = #tpu.pipeline_mode<synchronous>, transform_indices = @transform_2, window_bounds = array<i64: 1, 128>}, {pipeline_mode = #tpu.pipeline_mode<synchronous>, transform_indices = @transform_3, window_bounds = array<i64: 128, 128>}, {transform_indices = @transform_4, window_bounds = array<i64: 128, 128>}, {transform_indices = @transform_5, window_bounds = array<i64: 1, 2, 128>}]} {
    %c0 = arith.constant 0 : index
    %c0_0 = arith.constant 0 : index
    %0 = vector.load %arg1[%c0, %c0_0] : memref<128x128xf32, #tpu.memory_space<vmem>>, vector<128x128xf32>
    %c0_1 = arith.constant 0 : index
    %c0_2 = arith.constant 0 : index
    %1 = vector.load %arg2[%c0_1, %c0_2] : memref<1x128xf32, #tpu.memory_space<vmem>>, vector<1x128xf32>
    %2 = vector.broadcast %1 : vector<1x128xf32> to vector<128x128xf32>
    %3 = arith.mulf %0, %2 : vector<128x128xf32>
    %c0_3 = arith.constant 0 : index
    %c0_4 = arith.constant 0 : index
    %4 = vector.load %arg3[%c0_3, %c0_4] : memref<1x128xf32, #tpu.memory_space<vmem>>, vector<1x128xf32>
    %5 = vector.broadcast %4 : vector<1x128xf32> to vector<128x128xf32>
    %6 = arith.addf %3, %5 : vector<128x128xf32>
    %cst = arith.constant 0.000000e+00 : f32
    %7 = vector.broadcast %cst : f32 to vector<128x128xf32>
    %8 = arith.maximumf %6, %7 : vector<128x128xf32>
    %c128_i32 = arith.constant 128 : i32
    %9 = arith.muli %arg0, %c128_i32 : i32
    %10 = tpu.iota {dimensions = array<i32: 0>} : vector<128x1xi32>
    %11 = vector.broadcast %9 : i32 to vector<128x1xi32>
    %12 = arith.addi %11, %10 : vector<128x1xi32>
    %c128_i32_5 = arith.constant 128 : i32
    %13 = vector.broadcast %c128_i32_5 : i32 to vector<128x1xi32>
    %14 = arith.cmpi slt, %12, %13 : vector<128x1xi32>
    %cst_6 = arith.constant 0.000000e+00 : f32
    %15 = vector.shape_cast %14 : vector<128x1xi1> to vector<128x1xi1>
    %16 = vector.broadcast %15 : vector<128x1xi1> to vector<128x128xi1>
    %17 = vector.broadcast %cst_6 : f32 to vector<128x128xf32>
    %18 = arith.select %16, %8, %17 : vector<128x128xi1>, vector<128x128xf32>
    %19 = arith.truncf %18 : vector<128x128xf32> to vector<128x128xbf16>
    %c0_7 = arith.constant 0 : index
    %c0_8 = arith.constant 0 : index
    %20 = vector.load %arg4[%c0_7, %c0_8] : memref<128x128xbf16, #tpu.memory_space<vmem>>, vector<128x128xbf16>
    %cst_9 = arith.constant dense<0.000000e+00> : vector<128x128xf32>
    %21 = tpu.matmul %19, %20, %cst_9 {dimension_numbers = #tpu.dot_dimension_numbers<[1], [0], [0], [1], [0, 0, 1, 1], [], []>} : vector<128x128xbf16>, vector<128x128xbf16>, vector<128x128xf32> -> vector<128x128xf32>
    %c0_10 = arith.constant 0 : index
    %c0_11 = arith.constant 0 : index
    %22 = vector.load %arg5[%c0_10, %c0_11] : memref<128x128xf32, #tpu.memory_space<vmem>>, vector<128x128xf32>
    tpu.vector_store %arg5[%c0_10, %c0_11], %21 {strides = array<i32>} : memref<128x128xf32, #tpu.memory_space<vmem>>, vector<128x128xf32>,
    %cst_12 = arith.constant dense<0.000000e+00> : vector<128xf32>
    %23 = vector.multi_reduction <add>, %21, %cst_12 [0] : vector<128x128xf32> to vector<128xf32>
    %24 = vector.shape_cast %23 : vector<128xf32> to vector<1x128xf32>
    %25 = arith.mulf %21, %21 : vector<128x128xf32>
    %cst_13 = arith.constant dense<0.000000e+00> : vector<128xf32>
    %26 = vector.multi_reduction <add>, %25, %cst_13 [0] : vector<128x128xf32> to vector<128xf32>
    %27 = vector.shape_cast %26 : vector<128xf32> to vector<1x128xf32>
    %28 = tpu.concatenate %24, %27 in 0 : vector<1x128xf32>, vector<1x128xf32> -> vector<2x128xf32>
    %c0_14 = arith.constant 0 : index
    %c0_15 = arith.constant 0 : index
    %c0_16 = arith.constant 0 : index
    %29 = vector.load %arg6[%c0_14, %c0_15, %c0_16] : memref<1x2x128xf32, #tpu.memory_space<vmem>>, vector<1x2x128xf32>
    %30 = vector.shape_cast %29 : vector<1x2x128xf32> to vector<2x128xf32>
    %31 = vector.shape_cast %28 : vector<2x128xf32> to vector<1x2x128xf32>
    tpu.vector_store %arg6[%c0_14, %c0_15, %c0_16], %31 {strides = array<i32>} : memref<1x2x128xf32, #tpu.memory_space<vmem>>, vector<1x2x128xf32>,
    return
  }
  func.func @transform_0(%arg0: i32) -> (i32, i32) {
    %c0_i32 = arith.constant 0 : i32
    %c0_i32_0 = arith.constant 0 : i32
    return %arg0, %c0_i32 : i32, i32
  }
  func.func @transform_1(%arg0: i32) -> (i32, i32) {
    %c0_i32 = arith.constant 0 : i32
    %c0_i32_0 = arith.constant 0 : i32
    %c0_i32_1 = arith.constant 0 : i32
    return %c0_i32, %c0_i32_0 : i32, i32
  }
  func.func @transform_2(%arg0: i32) -> (i32, i32) {
    %c0_i32 = arith.constant 0 : i32
    %c0_i32_0 = arith.constant 0 : i32
    %c0_i32_1 = arith.constant 0 : i32
    return %c0_i32, %c0_i32_0 : i32, i32
  }
  func.func @transform_3(%arg0: i32) -> (i32, i32) {
    %c0_i32 = arith.constant 0 : i32
    %c0_i32_0 = arith.constant 0 : i32
    %c0_i32_1 = arith.constant 0 : i32
    return %c0_i32, %c0_i32_0 : i32, i32
  }
  func.func @transform_4(%arg0: i32) -> (i32, i32) {
    %c0_i32 = arith.constant 0 : i32
    %c0_i32_0 = arith.constant 0 : i32
    return %arg0, %c0_i32 : i32, i32
  }
  func.func @transform_5(%arg0: i32) -> (i32, i32, i32) {
    %c0_i32 = arith.constant 0 : i32
    %c0_i32_0 = arith.constant 0 : i32
    %c0_i32_1 = arith.constant 0 : i32
    return %arg0, %c0_i32, %c0_i32_0 : i32, i32, i32
  }
}

module attributes {stable_mosaic.version = 11 : i64} {
  func.func @_bn_add_relu_kernel(%arg0: i32, %arg1: memref<128x128xf32, #tpu.memory_space<vmem>>, %arg2: memref<1x128xf32, #tpu.memory_space<vmem>>, %arg3: memref<1x128xf32, #tpu.memory_space<vmem>>, %arg4: memref<128x128xf32, #tpu.memory_space<vmem>>, %arg5: memref<128x128xf32, #tpu.memory_space<vmem>>) attributes {dimension_semantics = [#tpu.dimension_semantics<parallel>], iteration_bounds = array<i64: 1>, scalar_prefetch = 0 : i64, scratch_operands = 0 : i64, tpu.core_type = #tpu.core_type<tc>, window_params = [{transform_indices = @transform_0, window_bounds = array<i64: 128, 128>}, {pipeline_mode = #tpu.pipeline_mode<synchronous>, transform_indices = @transform_1, window_bounds = array<i64: 1, 128>}, {pipeline_mode = #tpu.pipeline_mode<synchronous>, transform_indices = @transform_2, window_bounds = array<i64: 1, 128>}, {transform_indices = @transform_3, window_bounds = array<i64: 128, 128>}, {transform_indices = @transform_4, window_bounds = array<i64: 128, 128>}]} {
    %c0 = arith.constant 0 : index
    %c0_0 = arith.constant 0 : index
    %0 = vector.load %arg1[%c0, %c0_0] : memref<128x128xf32, #tpu.memory_space<vmem>>, vector<128x128xf32>
    %c0_1 = arith.constant 0 : index
    %c0_2 = arith.constant 0 : index
    %1 = vector.load %arg2[%c0_1, %c0_2] : memref<1x128xf32, #tpu.memory_space<vmem>>, vector<1x128xf32>
    %2 = vector.broadcast %1 : vector<1x128xf32> to vector<128x128xf32>
    %3 = arith.mulf %0, %2 : vector<128x128xf32>
    %c0_3 = arith.constant 0 : index
    %c0_4 = arith.constant 0 : index
    %4 = vector.load %arg3[%c0_3, %c0_4] : memref<1x128xf32, #tpu.memory_space<vmem>>, vector<1x128xf32>
    %5 = vector.broadcast %4 : vector<1x128xf32> to vector<128x128xf32>
    %6 = arith.addf %3, %5 : vector<128x128xf32>
    %c0_5 = arith.constant 0 : index
    %c0_6 = arith.constant 0 : index
    %7 = vector.load %arg4[%c0_5, %c0_6] : memref<128x128xf32, #tpu.memory_space<vmem>>, vector<128x128xf32>
    %8 = arith.addf %6, %7 : vector<128x128xf32>
    %cst = arith.constant 0.000000e+00 : f32
    %9 = vector.broadcast %cst : f32 to vector<128x128xf32>
    %10 = arith.maximumf %8, %9 : vector<128x128xf32>
    %c0_7 = arith.constant 0 : index
    %c0_8 = arith.constant 0 : index
    %11 = vector.load %arg5[%c0_7, %c0_8] : memref<128x128xf32, #tpu.memory_space<vmem>>, vector<128x128xf32>
    tpu.vector_store %arg5[%c0_7, %c0_8], %10 {strides = array<i32>} : memref<128x128xf32, #tpu.memory_space<vmem>>, vector<128x128xf32>,
    return
  }
  func.func @transform_0(%arg0: i32) -> (i32, i32) {
    %c0_i32 = arith.constant 0 : i32
    %c0_i32_0 = arith.constant 0 : i32
    return %arg0, %c0_i32 : i32, i32
  }
  func.func @transform_1(%arg0: i32) -> (i32, i32) {
    %c0_i32 = arith.constant 0 : i32
    %c0_i32_0 = arith.constant 0 : i32
    %c0_i32_1 = arith.constant 0 : i32
    return %c0_i32, %c0_i32_0 : i32, i32
  }
  func.func @transform_2(%arg0: i32) -> (i32, i32) {
    %c0_i32 = arith.constant 0 : i32
    %c0_i32_0 = arith.constant 0 : i32
    %c0_i32_1 = arith.constant 0 : i32
    return %c0_i32, %c0_i32_0 : i32, i32
  }
  func.func @transform_3(%arg0: i32) -> (i32, i32) {
    %c0_i32 = arith.constant 0 : i32
    %c0_i32_0 = arith.constant 0 : i32
    return %arg0, %c0_i32 : i32, i32
  }
  func.func @transform_4(%arg0: i32) -> (i32, i32) {
    %c0_i32 = arith.constant 0 : i32
    %c0_i32_0 = arith.constant 0 : i32
    return %arg0, %c0_i32 : i32, i32
  }
}

</mosaic_0001>

<bundles_post_ra>
// kernel: bottleneck_forward.7
= control target key start
LH: loop header
LB: loop body
LE: loop exit
PB: predicated region body
PF: predicated region fallthrough
CT: control target
= control target key end

     0   :  { %s367_s0 = inlined_call_operand.vmem [shape: f32[128,128], index: 0, kind: input, shape index: {}]   ;;  %s368_s1 = inlined_call_operand.vmem [shape: f32[1,128], index: 1, kind: input, shape index: {}]   ;;  %s369_s2 = inlined_call_operand.vmem [shape: f32[1,128], index: 2, kind: input, shape index: {}]   ;;  %s370_s3 = inlined_call_operand.vmem [shape: f32[128,128], index: 3, kind: input, shape index: {}]   ;;  %s371_s4 = inlined_call_operand.hbm [shape: f32[128,128], index: 4, kind: output, shape index: {}]  }
   0x1   :  { %v18_v0 = vld [vmem:[%s367_s0] sm:$0xff]  ;;  %v19_v4 = vld [vmem:[%s367_s0 + $0x8] sm:$0xff]  ;;  %v20_v7 = vld [vmem:[%s367_s0 + $0x10] sm:$0xff] }
   0x2   :  { %v223_v1 = vld [vmem:[%s368_s1] ss:$0 sm:$0xff]  ;;  %v21_v8 = vld [vmem:[%s367_s0 + $0x18] sm:$0xff]  ;;  %v81_v10 = vld [vmem:[%s370_s3 + $0x8] sm:$0xff] }
   0x3   :  { %v228_v2 = vld [vmem:[%s369_s2] ss:$0 sm:$0xff]  ;;  %v41_v3 = vmul.f32 %v223_v1, %v18_v0  ;;  %v42_v6 = vmul.f32 %v223_v1, %v19_v4  ;;  %v43_v11 = vmul.f32 %v223_v1, %v20_v7  ;;  %v82_v12 = vld [vmem:[%s370_s3 + $0x10] sm:$0xff]  ;;  %v44_v13 = vmul.f32 %v223_v1, %v21_v8  ;;  %v83_v16 = vld [vmem:[%s370_s3 + $0x18] sm:$0xff] }
   0x4   :  { %v80_v5 = vld [vmem:[%s370_s3] sm:$0xff]  ;;  %v23_v18 = vld [vmem:[%s367_s0 + $0x28] sm:$0xff]  ;;  %v24_v19 = vld [vmem:[%s367_s0 + $0x30] sm:$0xff] }
   0x5   :  { %v64_v9 = vadd.f32 %v228_v2, %v41_v3  ;;  %v22_v14 = vld [vmem:[%s367_s0 + $0x20] sm:$0xff]  ;;  %v65_v15 = vadd.f32 %v228_v2, %v42_v6  ;;  %v66_v21 = vadd.f32 %v228_v2, %v43_v11  ;;  %v67_v22 = vadd.f32 %v228_v2, %v44_v13  ;;  %v25_v25 = vld [vmem:[%s367_s0 + $0x38] sm:$0xff]  ;;  %v85_v28 = vld [vmem:[%s370_s3 + $0x28] sm:$0xff] }
   0x6   :  { %v45_v17 = vmul.f32 %v223_v1, %v22_v14  ;;  %v84_v23 = vld [vmem:[%s370_s3 + $0x20] sm:$0xff]  ;;  %v46_v24 = vmul.f32 %v223_v1, %v23_v18  ;;  %v47_v29 = vmul.f32 %v223_v1, %v24_v19  ;;  %v48_v30 = vmul.f32 %v223_v1, %v25_v25  ;;  %v86_v36 = vld [vmem:[%s370_s3 + $0x30] sm:$0xff]  ;;  %v87_v37 = vld [vmem:[%s370_s3 + $0x38] sm:$0xff] }
   0x7   :  { %v96_v20 = vadd.f32 %v80_v5, %v64_v9  ;;  %v97_v26 = vadd.f32 %v81_v10, %v65_v15  ;;  %v26_v31 = vld [vmem:[%s367_s0 + $0x40] sm:$0xff]  ;;  %v98_v33 = vadd.f32 %v82_v12, %v66_v21  ;;  %v99_v34 = vadd.f32 %v83_v16, %v67_v22  ;;  %v27_v38 = vld [vmem:[%s367_s0 + $0x48] sm:$0xff]  ;;  %v28_v43 = vld [vmem:[%s367_s0 + $0x50] sm:$0xff] }
   0x8   :  { %v68_v27 = vadd.f32 %v228_v2, %v45_v17  ;;  %v69_v35 = vadd.f32 %v228_v2, %v46_v24  ;;  %v70_v41 = vadd.f32 %v228_v2, %v47_v29  ;;  %v71_v42 = vadd.f32 %v228_v2, %v48_v30  ;;  %v29_v44 = vld [vmem:[%s367_s0 + $0x58] sm:$0xff]  ;;  %v30_v49 = vld [vmem:[%s367_s0 + $0x60] sm:$0xff]  ;;  %v89_v55 = vld [vmem:[%s370_s3 + $0x48] sm:$0xff] }
   0x9   :  { %v112_v32 = vmax.f32 %v96_v20, 0.0  ;;  %v113_v39 = vmax.f32 %v97_v26, 0.0  ;;  %v114_v45 = vmax.f32 %v98_v33, 0.0  ;;  %v115_v46 = vmax.f32 %v99_v34, 0.0  ;;  %v88_v53 = vld [vmem:[%s370_s3 + $0x40] sm:$0xff]  ;;  %v31_v56 = vld [vmem:[%s367_s0 + $0x68] sm:$0xff] }
   0xa   :  { %v100_v40 = vadd.f32 %v84_v23, %v68_v27  ;;  %v101_v47 = vadd.f32 %v85_v28, %v69_v35  ;;  %v49_v48 = vmul.f32 %v223_v1, %v26_v31  ;;  %v102_v51 = vadd.f32 %v86_v36, %v70_v41  ;;  %v32_v61 = vld [vmem:[%s367_s0 + $0x70] sm:$0xff]  ;;  %v33_v62 = vld [vmem:[%s367_s0 + $0x78] sm:$0xff] }
   0xb   :  { %128 = vst [vmem:[#allocation2] sm:$0xff] %v112_v32  ;;  %129 = vst [vmem:[#allocation2 + $0x8] sm:$0xff] %v113_v39  ;;  %v103_v52 = vadd.f32 %v87_v37, %v71_v42  ;;  %v50_v54 = vmul.f32 %v223_v1, %v27_v38  ;;  %v51_v59 = vmul.f32 %v223_v1, %v28_v43 }
   0xc   :  { %v116_v50 = vmax.f32 %v100_v40, 0.0  ;;  %130 = vst [vmem:[#allocation2 + $0x10] sm:$0xff] %v114_v45  ;;  %131 = vst [vmem:[#allocation2 + $0x18] sm:$0xff] %v115_v46  ;;  %v117_v57 = vmax.f32 %v101_v47, 0.0  ;;  %v72_v58 = vadd.f32 %v228_v2, %v49_v48  ;;  %v52_v60 = vmul.f32 %v223_v1, %v29_v44 }
   0xd   :  { %9 = vsyncpa [#allocation3], 0  ;;  %v118_v63 = vmax.f32 %v102_v51, 0.0  ;;  %v119_v0 = vmax.f32 %v103_v52, 0.0  ;;  %v73_v3 = vadd.f32 %v228_v2, %v50_v54  ;;  %v90_v4 = vld [vmem:[%s370_s3 + $0x50] sm:$0xff]  ;;  %v91_v5 = vld [vmem:[%s370_s3 + $0x58] sm:$0xff]  ;;  %v53_v6 = vmul.f32 %v223_v1, %v30_v49 }
   0xe   :  { %132 = vst [vmem:[#allocation2 + $0x20] sm:$0xff] %v116_v50  ;;  %133 = vst [vmem:[#allocation2 + $0x28] sm:$0xff] %v117_v57  ;;  %v104_v7 = vadd.f32 %v88_v53, %v72_v58  ;;  %v74_v8 = vadd.f32 %v228_v2, %v51_v59  ;;  %v75_v9 = vadd.f32 %v228_v2, %v52_v60  ;;  %v92_v10 = vld [vmem:[%s370_s3 + $0x60] sm:$0xff]  ;;  %v93_v14 = vld [vmem:[%s370_s3 + $0x68] sm:$0xff]  ;;  %s189_s1 = smov [#allocation2]  }
   0xf   :  { %v54_v11 = vmul.f32 %v223_v1, %v31_v56  ;;  %134 = vst [vmem:[#allocation2 + $0x30] sm:$0xff] %v118_v63  ;;  %135 = vst [vmem:[#allocation2 + $0x38] sm:$0xff] %v119_v0  ;;  %v105_v12 = vadd.f32 %v89_v55, %v73_v3  ;;  %v76_v13 = vadd.f32 %v228_v2, %v53_v6  ;;  %v94_v21 = vld [vmem:[%s370_s3 + $0x70] sm:$0xff]  ;;  %v95_v22 = vld [vmem:[%s370_s3 + $0x78] sm:$0xff]  ;;  %s149_s26 = sshll.u32 %s189_s1, 4  ;;  %s150_s26 = int_to_ptr.vmem [resolvable:$true] %s149_s26 }
  0x10   :  { %v55_v15 = vmul.f32 %v223_v1, %v32_v61  ;;  %v56_v16 = vmul.f32 %v223_v1, %v33_v62  ;;  %v120_v17 = vmax.f32 %v104_v7, 0.0  ;;  %v106_v18 = vadd.f32 %v90_v4, %v74_v8  ;;  %s165_s3 = scalar_lea.vmem %s150_s26, 2048  ;;  %p170_p1 = scmp.lt.s32.totalorder %s150_s26, %s150_s26 }
  0x11   :  { %v107_v19 = vadd.f32 %v91_v5, %v75_v9  ;;  %v77_v20 = vadd.f32 %v228_v2, %v54_v11  ;;  %v121_v23 = vmax.f32 %v105_v12, 0.0  ;;  %v108_v24 = vadd.f32 %v92_v10, %v76_v13  ;;  %p166_p0 = scmp.ne.s32.totalorder %s150_s26, %s165_s3  ;;  %p171_p2 = scmp.lt.s32.totalorder %s165_s3, %s165_s3 }
  0x12   :  { %v78_v25 = vadd.f32 %v228_v2, %v55_v15  ;;  %v79_v26 = vadd.f32 %v228_v2, %v56_v16  ;;  %136 = vst [vmem:[#allocation2 + $0x40] sm:$0xff] %v120_v17  ;;  %v122_v1 = vmax.f32 %v106_v18, 0.0 }
  0x13   :  { %v123_v27 = vmax.f32 %v107_v19, 0.0  ;;  %v109_v28 = vadd.f32 %v93_v14, %v77_v20  ;;  %137 = vst [vmem:[#allocation2 + $0x48] sm:$0xff] %v121_v23  ;;  %v124_v29 = vmax.f32 %v108_v24, 0.0  ;;  %p172_p3 = por %p171_p2, %p170_p1 }
  0x14   :  { %v110_v30 = vadd.f32 %v94_v21, %v78_v25  ;;  %v111_v31 = vadd.f32 %v95_v22, %v79_v26  ;;  %138 = vst [vmem:[#allocation2 + $0x50] sm:$0xff] %v122_v1 }
  0x15   :  { %139 = vst [vmem:[#allocation2 + $0x58] sm:$0xff] %v123_v27  ;;  %v125_v32 = vmax.f32 %v109_v28, 0.0  ;;  %140 = vst [vmem:[#allocation2 + $0x60] sm:$0xff] %v124_v29  ;;  %p173_p4 = pnand %p172_p3, %p166_p0 }
  0x16   :  { %v126_v33 = vmax.f32 %v110_v30, 0.0  ;;  %v127_v34 = vmax.f32 %v111_v31, 0.0 }
  0x17   :  { %141 = vst [vmem:[#allocation2 + $0x68] sm:$0xff] %v125_v32 }
  0x18   :  { %142 = vst [vmem:[#allocation2 + $0x70] sm:$0xff] %v126_v33  ;;  %143 = vst [vmem:[#allocation2 + $0x78] sm:$0xff] %v127_v34 }
  0x19   :  { %176 = shalt.err (!%p173_p4)
}
  0x1a   :  { %s177_s28 = scalar_lea.hbm %s371_s4, 2048 }
  0x1b   :  { %p178_p5 = scmp.ne.s32.totalorder %s371_s4, %s177_s28  ;;  %p181_p6 = scmp.lt.u32.totalorder %s177_s28, %s371_s4 }
  0x1d   :  { %p183_p7 = pnand %p181_p6, %p178_p5 }
  0x1f   :  { %186 = shalt.err (!%p183_p7)
}
  0x20   :  { %s190_s7 = smov 128   ;;  %s191_s8 = smov 8  }
  0x21   :  { %155 = dma.vmem_to_hbm [thread:$0]  %s150_s26, 2048, %s371_s4, [#allocation3], %s190_s7, %s190_s7, %s191_s8  }
  0x22   :  { %187 = dma.done.wait [#allocation3], 2048  }
  0x23   :  { %188 = vsyncadd [#allocation3], 4294965248 }
  0x24   :  { %159 = vsyncpa [#allocation3], 1 }

// kernel: bottleneck_forward.6
= control target key start
LH: loop header
LB: loop body
LE: loop exit
PB: predicated region body
PF: predicated region fallthrough
CT: control target
= control target key end

     0   :  { %vm440_vm0 = vcmask 1040384   ;;  %s728_s3 = inlined_call_operand.vmem [shape: bf16[128,128], index: 3, kind: input, shape index: {}]   ;;  %s729_s0 = inlined_call_operand.vmem [shape: f32[128,128], index: 0, kind: input, shape index: {}]   ;;  %s730_s1 = inlined_call_operand.vmem [shape: f32[1,128], index: 1, kind: input, shape index: {}]   ;;  %s731_s2 = inlined_call_operand.vmem [shape: f32[1,128], index: 2, kind: input, shape index: {}]   ;;  %s732_s4 = inlined_call_operand.vmem [shape: f32[128,128], index: 4, kind: output, shape index: {0}]   ;;  %s733_s5 = inlined_call_operand.vmem [shape: f32[1,2,128], index: 5, kind: output, shape index: {1}]  }
   0x1   :  { %v525_v0 = vld [vmem:[%s728_s3] sm:$0xff]   ;;  %v526_v1 = vld [vmem:[%s728_s3 + $0x8] sm:$0xff]   ;;  %v527_v2 = vld [vmem:[%s728_s3 + $0x10] sm:$0xff]  }
   0x2   :  { %477 = vmatprep.subr.bf16.mxu0 %v525_v0  ;;  %509 = vmatprep.subr.bf16.mxu1 %v525_v0  ;;  %v528_v3 = vld [vmem:[%s728_s3 + $0x18] sm:$0xff]   ;;  %v20_v4 = vld [vmem:[%s729_s0] sm:$0xff]  ;;  %v21_v5 = vld [vmem:[%s729_s0 + $0x8] sm:$0xff] }
   0x3   :  { %478 = vmatpush3.bf16.msra.mxu0 %v525_v0  ;;  %517 = vmatpush3.bf16.msra.mxu1 %v525_v0  ;;  %v584_v6 = vld [vmem:[%s730_s1] ss:$0 sm:$0xff]  ;;  %v29_v16 = vld [vmem:[%s729_s0 + $0x48] sm:$0xff]  ;;  %v22_v18 = vld [vmem:[%s729_s0 + $0x10] sm:$0xff] }
   0x4   :  { %479 = vmatprep.subr.bf16.mxu0 %v526_v1  ;;  %510 = vmatprep.subr.bf16.mxu1 %v526_v1  ;;  %v43_v7 = vmul.f32 %v584_v6, %v20_v4  ;;  %v44_v8 = vmul.f32 %v584_v6, %v21_v5  ;;  %v591_v9 = vld [vmem:[%s731_s2] ss:$0 sm:$0xff]  ;;  %v530_v17 = vld [vmem:[%s728_s3 + $0x28] sm:$0xff]   ;;  %v23_v19 = vld [vmem:[%s729_s0 + $0x18] sm:$0xff]  ;;  %v52_v26 = vmul.f32 %v584_v6, %v29_v16 }
   0x5   :  { %v529_v12 = vld [vmem:[%s728_s3 + $0x20] sm:$0xff]   ;;  %v30_v23 = vld [vmem:[%s729_s0 + $0x50] sm:$0xff]  ;;  %v31_v24 = vld [vmem:[%s729_s0 + $0x58] sm:$0xff]  ;;  %v45_v29 = vmul.f32 %v584_v6, %v22_v18  ;;  %v46_v30 = vmul.f32 %v584_v6, %v23_v19 }
   0x6   :  { %v66_v10 = vadd.f32 %v591_v9, %v43_v7  ;;  %v67_v11 = vadd.f32 %v591_v9, %v44_v8  ;;  %v28_v13 = vld [vmem:[%s729_s0 + $0x40] sm:$0xff]  ;;  %v25_v25 = vld [vmem:[%s729_s0 + $0x28] sm:$0xff]  ;;  %v75_v33 = vadd.f32 %v591_v9, %v52_v26  ;;  %v53_v34 = vmul.f32 %v584_v6, %v30_v23  ;;  %v531_v40 = vld [vmem:[%s728_s3 + $0x30] sm:$0xff]  }
   0x7   :  { %480 = vmatpush3.bf16.msra.mxu0 %v526_v1  ;;  %518 = vmatpush3.bf16.msra.mxu1 %v526_v1  ;;  %v24_v21 = vld [vmem:[%s729_s0 + $0x20] sm:$0xff]  ;;  %v51_v22 = vmul.f32 %v584_v6, %v28_v13  ;;  %v33_v28 = vld [vmem:[%s729_s0 + $0x68] sm:$0xff]  ;;  %v54_v35 = vmul.f32 %v584_v6, %v31_v24  ;;  %v48_v36 = vmul.f32 %v584_v6, %v25_v25  ;;  %v26_v45 = vld [vmem:[%s729_s0 + $0x30] sm:$0xff] }
   0x8   :  { %481 = vmatprep.subr.bf16.mxu0 %v527_v2  ;;  %511 = vmatprep.subr.bf16.mxu1 %v527_v2  ;;  %v82_v14 = vmax.f32 %v66_v10, 0.0  ;;  %v83_v15 = vmax.f32 %v67_v11, 0.0  ;;  %v32_v27 = vld [vmem:[%s729_s0 + $0x60] sm:$0xff]  ;;  %v47_v32 = vmul.f32 %v584_v6, %v24_v21  ;;  %v56_v39 = vmul.f32 %v584_v6, %v33_v28  ;;  %v27_v46 = vld [vmem:[%s729_s0 + $0x38] sm:$0xff]  ;;  %v34_v53 = vld [vmem:[%s729_s0 + $0x70] sm:$0xff] }
   0x9   :  { %v74_v31 = vadd.f32 %v591_v9, %v51_v22  ;;  %v55_v38 = vmul.f32 %v584_v6, %v32_v27  ;;  %v91_v41 = vmax.f32 %v75_v33, 0.0  ;;  %v68_v42 = vadd.f32 %v591_v9, %v45_v29  ;;  %v35_v54 = vld [vmem:[%s729_s0 + $0x78] sm:$0xff] }
   0xa   :  { %v197_v20 = vpack.c.bf16 %v83_v15, %v82_v14  ;;  %v69_v43 = vadd.f32 %v591_v9, %v46_v30  ;;  %v70_v44 = vadd.f32 %v591_v9, %v47_v32  ;;  %v76_v48 = vadd.f32 %v591_v9, %v53_v34  ;;  %v532_v55 = vld [vmem:[%s728_s3 + $0x38] sm:$0xff]  }
   0xb   :  { %482 = vmatpush3.bf16.msra.mxu0 %v527_v2  ;;  %519 = vmatpush3.bf16.msra.mxu1 %v527_v2  ;;  %v90_v37 = vmax.f32 %v74_v31, 0.0  ;;  %v77_v49 = vadd.f32 %v591_v9, %v54_v35  ;;  %v71_v50 = vadd.f32 %v591_v9, %v48_v36  ;;  %v78_v51 = vadd.f32 %v591_v9, %v55_v38 }
   0xc   :  { %483 = vmatprep.subr.bf16.mxu0 %v528_v3  ;;  %512 = vmatprep.subr.bf16.mxu1 %v528_v3  ;;  %v79_v52 = vadd.f32 %v591_v9, %v56_v39  ;;  %v84_v56 = vmax.f32 %v68_v42, 0.0  ;;  %v85_v57 = vmax.f32 %v69_v43, 0.0  ;;  %v49_v58 = vmul.f32 %v584_v6, %v26_v45 }
   0xd   :  { %493 = vmatprep.mubr.bf16.mxu0 %v197_v20  ;;  %v201_v47 = vpack.c.bf16 %v91_v41, %v90_v37  ;;  %v50_v59 = vmul.f32 %v584_v6, %v27_v46  ;;  %v92_v60 = vmax.f32 %v76_v48, 0.0  ;;  %v93_v61 = vmax.f32 %v77_v49, 0.0 }
   0xe   :  { %v57_v62 = vmul.f32 %v584_v6, %v34_v53  ;;  %v58_v63 = vmul.f32 %v584_v6, %v35_v54  ;;  %v86_v0 = vmax.f32 %v70_v44, 0.0  ;;  %v87_v1 = vmax.f32 %v71_v50, 0.0 }
   0xf   :  { %484 = vmatpush3.bf16.msra.mxu0 %v528_v3  ;;  %520 = vmatpush3.bf16.msra.mxu1 %v528_v3  ;;  %v94_v2 = vmax.f32 %v78_v51, 0.0  ;;  %v95_v3 = vmax.f32 %v79_v52, 0.0  ;;  %v198_v4 = vpack.c.bf16 %v85_v57, %v84_v56  ;;  %v72_v5 = vadd.f32 %v591_v9, %v49_v58 }
  0x10   :  { %485 = vmatprep.subr.bf16.mxu0 %v529_v12  ;;  %513 = vmatprep.subr.bf16.mxu1 %v529_v12  ;;  %v73_v7 = vadd.f32 %v591_v9, %v50_v59  ;;  %v202_v8 = vpack.c.bf16 %v93_v61, %v92_v60  ;;  %v80_v10 = vadd.f32 %v591_v9, %v57_v62 }
  0x11   :  { %501 = vmatprep.mubr.bf16.mxu1 %v201_v47  ;;  %v81_v11 = vadd.f32 %v591_v9, %v58_v63  ;;  %v199_v6 = vpack.c.bf16 %v87_v1, %v86_v0  ;;  %v88_v13 = vmax.f32 %v72_v5, 0.0 }
  0x12   :  { %v89_v14 = vmax.f32 %v73_v7, 0.0  ;;  %v96_v15 = vmax.f32 %v80_v10, 0.0 }
  0x13   :  { %486 = vmatpush3.bf16.msra.mxu0 %v529_v12  ;;  %521 = vmatpush3.bf16.msra.mxu1 %v529_v12  ;;  %v203_v12 = vpack.c.bf16 %v95_v3, %v94_v2  ;;  %v97_v16 = vmax.f32 %v81_v11, 0.0 }
  0x14   :  { %487 = vmatprep.subr.bf16.mxu0 %v530_v17  ;;  %514 = vmatprep.subr.bf16.mxu1 %v530_v17 }
  0x15   :  { %v204_v18 = vpack.c.bf16 %v97_v16, %v96_v15 }
  0x17   :  { %488 = vmatpush3.bf16.msra.mxu0 %v530_v17  ;;  %522 = vmatpush3.bf16.msra.mxu1 %v530_v17  ;;  %v200_v17 = vpack.c.bf16 %v89_v14, %v88_v13 }
  0x18   :  { %489 = vmatprep.subr.bf16.mxu0 %v531_v40  ;;  %515 = vmatprep.subr.bf16.mxu1 %v531_v40 }
  0x1b   :  { %490 = vmatpush3.bf16.msra.mxu0 %v531_v40  ;;  %523 = vmatpush3.bf16.msra.mxu1 %v531_v40 }
  0x1c   :  { %491 = vmatprep.subr.bf16.mxu0 %v532_v55  ;;  %516 = vmatprep.subr.bf16.mxu1 %v532_v55 }
  0x1f   :  { %492 = vmatpush3.bf16.msra.mxu0 %v532_v55  ;;  %524 = vmatpush3.bf16.msra.mxu1 %v532_v55 }
  0x22   :  { %494 = vmatmul.mubr.bf16.vlgmr.msra.gmra.mrb[0].mxu0 %v198_v4  ;;  %502 = vmatmul.mubr.bf16.vlgmr.msra.gmra.mrb[0].mxu1 %v202_v8 }
  0x23   :  { %497 = vmatprep.mubr.bf16.mxu0 %v199_v6  ;;  %505 = vmatprep.mubr.bf16.mxu1 %v203_v12 }
  0x2a   :  { %498 = vmatmul.mubr.bf16.gmra.mrb[4].mxu0 %v200_v17  ;;  %506 = vmatmul.mubr.bf16.gmra.mrb[4].mxu1 %v204_v18 }
  0xf5   :  { %v495_v19 = vpop.f32.mrb[0].mxu0  ;;  %v503_v20 = vpop.f32.mrb[0].mxu1 }
  0xf6   :  { %368 = vst [vmem:[%s732_s4 + $0x10] sm:$0xff] %v495_v19  ;;  %v303_v9 = vpop.f32.mrb[1].mxu0  ;;  %376 = vst [vmem:[%s732_s4 + $0x50] sm:$0xff] %v503_v20  ;;  %v335_v21 = vpop.f32.mrb[1].mxu1  ;;  %v405_v29 = vmul.f32 %v495_v19, %v495_v19  ;;  %v413_v61 = vmul.f32 %v503_v20, %v503_v20 }
  0xf7   :  { %366 = vst [vmem:[%s732_s4] sm:$0xff] %v303_v9  ;;  %v496_v22 = vpop.f32.mrb[2].mxu0  ;;  %374 = vst [vmem:[%s732_s4 + $0x40] sm:$0xff] %v335_v21  ;;  %v504_v23 = vpop.f32.mrb[2].mxu1  ;;  %v403_v26 = vmul.f32 %v303_v9, %v303_v9  ;;  %v411_v55 = vmul.f32 %v335_v21, %v335_v21 }
  0xf8   :  { %369 = vst [vmem:[%s732_s4 + $0x18] sm:$0xff] %v496_v22  ;;  %v306_v24 = vpop.f32.mrb[3].mxu0  ;;  %377 = vst [vmem:[%s732_s4 + $0x58] sm:$0xff] %v504_v23  ;;  %v338_v25 = vpop.f32.mrb[3].mxu1  ;;  %v406_v32 = vmul.f32 %v496_v22, %v496_v22  ;;  %v414_v0 = vmul.f32 %v504_v23, %v504_v23 }
  0xf9   :  { %367 = vst [vmem:[%s732_s4 + $0x8] sm:$0xff] %v306_v24  ;;  %v382_v27 = vadd.f32 %v306_v24, %v303_v9  ;;  %v404_v28 = vmul.f32 %v306_v24, %v306_v24  ;;  %375 = vst [vmem:[%s732_s4 + $0x48] sm:$0xff] %v338_v25  ;;  %v412_v60 = vmul.f32 %v338_v25, %v338_v25 }
  0xfb   :  { %v383_v30 = vadd.f32 %v495_v19, %v382_v27  ;;  %v419_v31 = vadd.f32 %v404_v28, %v403_v26 }
  0xfd   :  { %v420_v33 = vadd.f32 %v419_v31, %v405_v29  ;;  %v499_v34 = vpop.f32.mrb[4].mxu0  ;;  %v384_v35 = vadd.f32 %v496_v22, %v383_v30  ;;  %v507_v36 = vpop.f32.mrb[4].mxu1 }
  0xfe   :  { %372 = vst [vmem:[%s732_s4 + $0x30] sm:$0xff] %v499_v34  ;;  %v319_v37 = vpop.f32.mrb[5].mxu0  ;;  %380 = vst [vmem:[%s732_s4 + $0x70] sm:$0xff] %v507_v36  ;;  %v351_v38 = vpop.f32.mrb[5].mxu1  ;;  %v409_v49 = vmul.f32 %v499_v34, %v499_v34  ;;  %v417_v11 = vmul.f32 %v507_v36, %v507_v36 }
  0xff   :  { %370 = vst [vmem:[%s732_s4 + $0x20] sm:$0xff] %v319_v37  ;;  %v385_v39 = vadd.f32 %v384_v35, %v319_v37  ;;  %v407_v40 = vmul.f32 %v319_v37, %v319_v37  ;;  %v421_v41 = vadd.f32 %v420_v33, %v406_v32  ;;  %v500_v42 = vpop.f32.mrb[6].mxu0  ;;  %378 = vst [vmem:[%s732_s4 + $0x60] sm:$0xff] %v351_v38  ;;  %v508_v43 = vpop.f32.mrb[6].mxu1 }
 0x100   :  { %373 = vst [vmem:[%s732_s4 + $0x38] sm:$0xff] %v500_v42  ;;  %v322_v44 = vpop.f32.mrb[7].mxu0  ;;  %381 = vst [vmem:[%s732_s4 + $0x78] sm:$0xff] %v508_v43  ;;  %v354_v45 = vpop.f32.mrb[7].mxu1  ;;  %v410_v52 = vmul.f32 %v500_v42, %v500_v42  ;;  %v415_v3 = vmul.f32 %v351_v38, %v351_v38  ;;  %v418_v13 = vmul.f32 %v508_v43, %v508_v43 }
 0x101   :  { %v422_v46 = vadd.f32 %v421_v41, %v407_v40  ;;  %371 = vst [vmem:[%s732_s4 + $0x28] sm:$0xff] %v322_v44  ;;  %v386_v47 = vadd.f32 %v385_v39, %v322_v44  ;;  %v408_v48 = vmul.f32 %v322_v44, %v322_v44  ;;  %379 = vst [vmem:[%s732_s4 + $0x68] sm:$0xff] %v354_v45 }
 0x102   :  { %v416_v10 = vmul.f32 %v354_v45, %v354_v45 }
 0x103   :  { %v387_v50 = vadd.f32 %v499_v34, %v386_v47  ;;  %v423_v51 = vadd.f32 %v422_v46, %v408_v48 }
 0x105   :  { %v424_v53 = vadd.f32 %v423_v51, %v409_v49  ;;  %v388_v54 = vadd.f32 %v500_v42, %v387_v50 }
 0x107   :  { %v389_v56 = vadd.f32 %v388_v54, %v335_v21  ;;  %v425_v57 = vadd.f32 %v424_v53, %v410_v52 }
 0x109   :  { %v426_v58 = vadd.f32 %v425_v57, %v411_v55  ;;  %v390_v59 = vadd.f32 %v389_v56, %v338_v25 }
 0x10b   :  { %v391_v62 = vadd.f32 %v503_v20, %v390_v59  ;;  %v427_v63 = vadd.f32 %v426_v58, %v412_v60 }
 0x10d   :  { %v428_v1 = vadd.f32 %v427_v63, %v413_v61  ;;  %v392_v2 = vadd.f32 %v504_v23, %v391_v62 }
 0x10f   :  { %v393_v4 = vadd.f32 %v392_v2, %v351_v38  ;;  %v429_v5 = vadd.f32 %v428_v1, %v414_v0 }
 0x111   :  { %v430_v7 = vadd.f32 %v429_v5, %v415_v3  ;;  %v394_v8 = vadd.f32 %v393_v4, %v354_v45 }
 0x113   :  { %v395_v6 = vadd.f32 %v507_v36, %v394_v8  ;;  %v431_v12 = vadd.f32 %v430_v7, %v416_v10 }
 0x115   :  { %v396_v14 = vadd.f32 %v508_v43, %v395_v6  ;;  %v432_v15 = vadd.f32 %v431_v12, %v417_v11 }
 0x117   :  { %v397_v16 = vrot.slane %v396_v14, 4  ;;  %v433_v17 = vadd.f32 %v432_v15, %v418_v13 }
 0x119   :  { %v398_v18 = vadd.f32 %v397_v16, %v396_v14  ;;  %v434_v19 = vrot.slane %v433_v17, 4 }
 0x11b   :  { %v399_v20 = vrot.slane %v398_v18, 2  ;;  %v435_v9 = vadd.f32 %v434_v19, %v433_v17 }
 0x11d   :  { %v400_v21 = vadd.f32 %v399_v20, %v398_v18  ;;  %v436_v22 = vrot.slane %v435_v9, 2 }
 0x11f   :  { %v401_v23 = vrot.slane %v400_v21, 1  ;;  %v437_v24 = vadd.f32 %v436_v22, %v435_v9 }
 0x121   :  { %v438_v25 = vrot.slane %v437_v24, 1  ;;  %v402_v26 = vadd.f32 %v401_v23, %v400_v21 }
 0x123   :  { %v439_v27 = vadd.f32 %v438_v25, %v437_v24 }
 0x125   :  { %v441_v28 = vsel %vm440_vm0, %v402_v26, %v439_v27 }
 0x126   :  { %442 = vst [vmem:[%s733_s5] sm:$0x3] %v441_v28 }

// kernel: bottleneck_forward.4
= control target key start
LH: loop header
LB: loop body
LE: loop exit
PB: predicated region body
PF: predicated region fallthrough
CT: control target
= control target key end

     0   :  { %vm313_vm0 = vcmask 1040384   ;;  %s539_s1 = inlined_call_operand.vmem [shape: bf16[128,128], index: 1, kind: input, shape index: {}]   ;;  %s540_s0 = inlined_call_operand.vmem [shape: bf16[128,128], index: 0, kind: input, shape index: {}]   ;;  %s541_s2 = inlined_call_operand.vmem [shape: f32[128,128], index: 2, kind: output, shape index: {0}]   ;;  %s542_s3 = inlined_call_operand.vmem [shape: f32[1,2,128], index: 3, kind: output, shape index: {1}]  }
   0x1   :  { %v404_v0 = vld [vmem:[%s539_s1] sm:$0xff]   ;;  %v405_v1 = vld [vmem:[%s539_s1 + $0x8] sm:$0xff]   ;;  %v406_v2 = vld [vmem:[%s539_s1 + $0x10] sm:$0xff]  }
   0x2   :  { %356 = vmatprep.subr.bf16.mxu0 %v404_v0  ;;  %388 = vmatprep.subr.bf16.mxu1 %v404_v0  ;;  %v407_v3 = vld [vmem:[%s539_s1 + $0x18] sm:$0xff]   ;;  %v412_v4 = vld [vmem:[%s540_s0] sm:$0xff]   ;;  %v409_v7 = vld [vmem:[%s539_s1 + $0x28] sm:$0xff]  }
   0x3   :  { %357 = vmatpush3.bf16.msra.mxu0 %v404_v0  ;;  %396 = vmatpush3.bf16.msra.mxu1 %v404_v0  ;;  %v408_v5 = vld [vmem:[%s539_s1 + $0x20] sm:$0xff]   ;;  %v410_v8 = vld [vmem:[%s539_s1 + $0x30] sm:$0xff]   ;;  %v411_v9 = vld [vmem:[%s539_s1 + $0x38] sm:$0xff]  }
   0x4   :  { %358 = vmatprep.subr.bf16.mxu0 %v405_v1  ;;  %389 = vmatprep.subr.bf16.mxu1 %v405_v1  ;;  %v416_v6 = vld [vmem:[%s540_s0 + $0x20] sm:$0xff]   ;;  %v413_v10 = vld [vmem:[%s540_s0 + $0x8] sm:$0xff]   ;;  %v414_v12 = vld [vmem:[%s540_s0 + $0x10] sm:$0xff]  }
   0x5   :  { %372 = vmatprep.mubr.bf16.mxu0 %v412_v4  ;;  %380 = vmatprep.mubr.bf16.mxu1 %v416_v6  ;;  %v417_v11 = vld [vmem:[%s540_s0 + $0x28] sm:$0xff]   ;;  %v418_v13 = vld [vmem:[%s540_s0 + $0x30] sm:$0xff]   ;;  %v415_v14 = vld [vmem:[%s540_s0 + $0x18] sm:$0xff]  }
   0x6   :  { %v419_v15 = vld [vmem:[%s540_s0 + $0x38] sm:$0xff]  }
   0x7   :  { %359 = vmatpush3.bf16.msra.mxu0 %v405_v1  ;;  %397 = vmatpush3.bf16.msra.mxu1 %v405_v1 }
   0x8   :  { %360 = vmatprep.subr.bf16.mxu0 %v406_v2  ;;  %390 = vmatprep.subr.bf16.mxu1 %v406_v2 }
   0xb   :  { %361 = vmatpush3.bf16.msra.mxu0 %v406_v2  ;;  %398 = vmatpush3.bf16.msra.mxu1 %v406_v2 }
   0xc   :  { %362 = vmatprep.subr.bf16.mxu0 %v407_v3  ;;  %391 = vmatprep.subr.bf16.mxu1 %v407_v3 }
   0xf   :  { %363 = vmatpush3.bf16.msra.mxu0 %v407_v3  ;;  %399 = vmatpush3.bf16.msra.mxu1 %v407_v3 }
  0x10   :  { %364 = vmatprep.subr.bf16.mxu0 %v408_v5  ;;  %392 = vmatprep.subr.bf16.mxu1 %v408_v5 }
  0x13   :  { %365 = vmatpush3.bf16.msra.mxu0 %v408_v5  ;;  %400 = vmatpush3.bf16.msra.mxu1 %v408_v5 }
  0x14   :  { %366 = vmatprep.subr.bf16.mxu0 %v409_v7  ;;  %393 = vmatprep.subr.bf16.mxu1 %v409_v7 }
  0x17   :  { %367 = vmatpush3.bf16.msra.mxu0 %v409_v7  ;;  %401 = vmatpush3.bf16.msra.mxu1 %v409_v7 }
  0x18   :  { %368 = vmatprep.subr.bf16.mxu0 %v410_v8  ;;  %394 = vmatprep.subr.bf16.mxu1 %v410_v8 }
  0x1b   :  { %369 = vmatpush3.bf16.msra.mxu0 %v410_v8  ;;  %402 = vmatpush3.bf16.msra.mxu1 %v410_v8 }
  0x1c   :  { %370 = vmatprep.subr.bf16.mxu0 %v411_v9  ;;  %395 = vmatprep.subr.bf16.mxu1 %v411_v9 }
  0x1f   :  { %371 = vmatpush3.bf16.msra.mxu0 %v411_v9  ;;  %403 = vmatpush3.bf16.msra.mxu1 %v411_v9 }
  0x22   :  { %373 = vmatmul.mubr.bf16.vlgmr.msra.gmra.mrb[0].mxu0 %v413_v10  ;;  %381 = vmatmul.mubr.bf16.vlgmr.msra.gmra.mrb[0].mxu1 %v417_v11 }
  0x23   :  { %376 = vmatprep.mubr.bf16.mxu0 %v414_v12  ;;  %384 = vmatprep.mubr.bf16.mxu1 %v418_v13 }
  0x2a   :  { %377 = vmatmul.mubr.bf16.gmra.mrb[4].mxu0 %v415_v14  ;;  %385 = vmatmul.mubr.bf16.gmra.mrb[4].mxu1 %v419_v15 }
  0xf5   :  { %v374_v16 = vpop.f32.mrb[0].mxu0  ;;  %v382_v17 = vpop.f32.mrb[0].mxu1 }
  0xf6   :  { %241 = vst [vmem:[%s541_s2 + $0x10] sm:$0xff] %v374_v16  ;;  %v176_v18 = vpop.f32.mrb[1].mxu0  ;;  %249 = vst [vmem:[%s541_s2 + $0x50] sm:$0xff] %v382_v17  ;;  %v208_v19 = vpop.f32.mrb[1].mxu1  ;;  %v278_v27 = vmul.f32 %v374_v16, %v374_v16  ;;  %v286_v59 = vmul.f32 %v382_v17, %v382_v17 }
  0xf7   :  { %239 = vst [vmem:[%s541_s2] sm:$0xff] %v176_v18  ;;  %v375_v20 = vpop.f32.mrb[2].mxu0  ;;  %247 = vst [vmem:[%s541_s2 + $0x40] sm:$0xff] %v208_v19  ;;  %v383_v21 = vpop.f32.mrb[2].mxu1  ;;  %v276_v24 = vmul.f32 %v176_v18, %v176_v18  ;;  %v284_v53 = vmul.f32 %v208_v19, %v208_v19 }
  0xf8   :  { %242 = vst [vmem:[%s541_s2 + $0x18] sm:$0xff] %v375_v20  ;;  %v179_v22 = vpop.f32.mrb[3].mxu0  ;;  %250 = vst [vmem:[%s541_s2 + $0x58] sm:$0xff] %v383_v21  ;;  %v211_v23 = vpop.f32.mrb[3].mxu1  ;;  %v279_v30 = vmul.f32 %v375_v20, %v375_v20  ;;  %v287_v62 = vmul.f32 %v383_v21, %v383_v21 }
  0xf9   :  { %240 = vst [vmem:[%s541_s2 + $0x8] sm:$0xff] %v179_v22  ;;  %v255_v25 = vadd.f32 %v179_v22, %v176_v18  ;;  %v277_v26 = vmul.f32 %v179_v22, %v179_v22  ;;  %248 = vst [vmem:[%s541_s2 + $0x48] sm:$0xff] %v211_v23  ;;  %v285_v58 = vmul.f32 %v211_v23, %v211_v23 }
  0xfb   :  { %v256_v28 = vadd.f32 %v374_v16, %v255_v25  ;;  %v292_v29 = vadd.f32 %v277_v26, %v276_v24 }
  0xfd   :  { %v293_v31 = vadd.f32 %v292_v29, %v278_v27  ;;  %v378_v32 = vpop.f32.mrb[4].mxu0  ;;  %v257_v33 = vadd.f32 %v375_v20, %v256_v28  ;;  %v386_v34 = vpop.f32.mrb[4].mxu1 }
  0xfe   :  { %245 = vst [vmem:[%s541_s2 + $0x30] sm:$0xff] %v378_v32  ;;  %v192_v35 = vpop.f32.mrb[5].mxu0  ;;  %253 = vst [vmem:[%s541_s2 + $0x70] sm:$0xff] %v386_v34  ;;  %v224_v36 = vpop.f32.mrb[5].mxu1  ;;  %v282_v47 = vmul.f32 %v378_v32, %v378_v32  ;;  %v290_v7 = vmul.f32 %v386_v34, %v386_v34 }
  0xff   :  { %243 = vst [vmem:[%s541_s2 + $0x20] sm:$0xff] %v192_v35  ;;  %v258_v37 = vadd.f32 %v257_v33, %v192_v35  ;;  %v280_v38 = vmul.f32 %v192_v35, %v192_v35  ;;  %v294_v39 = vadd.f32 %v293_v31, %v279_v30  ;;  %v379_v40 = vpop.f32.mrb[6].mxu0  ;;  %251 = vst [vmem:[%s541_s2 + $0x60] sm:$0xff] %v224_v36  ;;  %v387_v41 = vpop.f32.mrb[6].mxu1 }
 0x100   :  { %246 = vst [vmem:[%s541_s2 + $0x38] sm:$0xff] %v379_v40  ;;  %v195_v42 = vpop.f32.mrb[7].mxu0  ;;  %254 = vst [vmem:[%s541_s2 + $0x78] sm:$0xff] %v387_v41  ;;  %v227_v43 = vpop.f32.mrb[7].mxu1  ;;  %v283_v50 = vmul.f32 %v379_v40, %v379_v40  ;;  %v288_v1 = vmul.f32 %v224_v36, %v224_v36  ;;  %v291_v10 = vmul.f32 %v387_v41, %v387_v41 }
 0x101   :  { %v295_v44 = vadd.f32 %v294_v39, %v280_v38  ;;  %244 = vst [vmem:[%s541_s2 + $0x28] sm:$0xff] %v195_v42  ;;  %v259_v45 = vadd.f32 %v258_v37, %v195_v42  ;;  %v281_v46 = vmul.f32 %v195_v42, %v195_v42  ;;  %252 = vst [vmem:[%s541_s2 + $0x68] sm:$0xff] %v227_v43 }
 0x102   :  { %v289_v6 = vmul.f32 %v227_v43, %v227_v43 }
 0x103   :  { %v260_v48 = vadd.f32 %v378_v32, %v259_v45  ;;  %v296_v49 = vadd.f32 %v295_v44, %v281_v46 }
 0x105   :  { %v297_v51 = vadd.f32 %v296_v49, %v282_v47  ;;  %v261_v52 = vadd.f32 %v379_v40, %v260_v48 }
 0x107   :  { %v262_v54 = vadd.f32 %v261_v52, %v208_v19  ;;  %v298_v55 = vadd.f32 %v297_v51, %v283_v50 }
 0x109   :  { %v299_v56 = vadd.f32 %v298_v55, %v284_v53  ;;  %v263_v57 = vadd.f32 %v262_v54, %v211_v23 }
 0x10b   :  { %v264_v60 = vadd.f32 %v382_v17, %v263_v57  ;;  %v300_v61 = vadd.f32 %v299_v56, %v285_v58 }
 0x10d   :  { %v301_v63 = vadd.f32 %v300_v61, %v286_v59  ;;  %v265_v0 = vadd.f32 %v383_v21, %v264_v60 }
 0x10f   :  { %v266_v2 = vadd.f32 %v265_v0, %v224_v36  ;;  %v302_v3 = vadd.f32 %v301_v63, %v287_v62 }
 0x111   :  { %v303_v4 = vadd.f32 %v302_v3, %v288_v1  ;;  %v267_v5 = vadd.f32 %v266_v2, %v227_v43 }
 0x113   :  { %v268_v8 = vadd.f32 %v386_v34, %v267_v5  ;;  %v304_v9 = vadd.f32 %v303_v4, %v289_v6 }
 0x115   :  { %v269_v11 = vadd.f32 %v387_v41, %v268_v8  ;;  %v305_v12 = vadd.f32 %v304_v9, %v290_v7 }
 0x117   :  { %v270_v13 = vrot.slane %v269_v11, 4  ;;  %v306_v14 = vadd.f32 %v305_v12, %v291_v10 }
 0x119   :  { %v271_v15 = vadd.f32 %v270_v13, %v269_v11  ;;  %v307_v16 = vrot.slane %v306_v14, 4 }
 0x11b   :  { %v272_v17 = vrot.slane %v271_v15, 2  ;;  %v308_v18 = vadd.f32 %v307_v16, %v306_v14 }
 0x11d   :  { %v273_v19 = vadd.f32 %v272_v17, %v271_v15  ;;  %v309_v20 = vrot.slane %v308_v18, 2 }
 0x11f   :  { %v274_v21 = vrot.slane %v273_v19, 1  ;;  %v310_v22 = vadd.f32 %v309_v20, %v308_v18 }
 0x121   :  { %v311_v23 = vrot.slane %v310_v22, 1  ;;  %v275_v24 = vadd.f32 %v274_v21, %v273_v19 }
 0x123   :  { %v312_v25 = vadd.f32 %v311_v23, %v310_v22 }
 0x125   :  { %v314_v26 = vsel %vm313_vm0, %v275_v24, %v312_v25 }
 0x126   :  { %315 = vst [vmem:[%s542_s3] sm:$0x3] %v314_v26 }

// kernel: bottleneck_forward.5
= control target key start
LH: loop header
LB: loop body
LE: loop exit
PB: predicated region body
PF: predicated region fallthrough
CT: control target
= control target key end

     0   :  { %s2737_s18 = smov 0   ;;  %s3502_s0 = inlined_call_operand.vmem [shape: f32[2,8,8,128], index: 0, kind: input, shape index: {}]   ;;  %s3503_s1 = inlined_call_operand.vmem [shape: f32[1,128], index: 1, kind: input, shape index: {}]   ;;  %s3504_s2 = inlined_call_operand.vmem [shape: f32[1,128], index: 2, kind: input, shape index: {}]   ;;  %s3505_s3 = inlined_call_operand.vmem [shape: bf16[1152,128], index: 3, kind: input, shape index: {}]   ;;  %s3506_s4 = inlined_call_operand.vmem [shape: f32[2,64,128], index: 4, kind: output, shape index: {0}]   ;;  %s3507_s5 = inlined_call_operand.vmem [shape: f32[2,2,128], index: 5, kind: output, shape index: {1}]  }
   0x1 LB: > { %s2229_s19 = sadd.s32 4294967295, %s2704_s18   ;;  %p2233_p0 = scmp.ge.s32.totalorder %s2704_s18, 1  ;;  %s2704_s18 = sphi %s2737_s18, %s16_s18  }
   0x2   : > { %p190_p1 = scmp.lt.s32.totalorder %s2704_s18, 3 }
   0x4   : > { %p191_p2 = pnand %p2233_p0, %p190_p1 }
   0x5   : > { %v2614_v0 = vld [vmem:[%s3505_s3 + $0xc0] sm:$0xff] (!%p191_p2)   ;;  %v2616_v2 = vld [vmem:[%s3505_s3 + $0xc8] sm:$0xff] (!%p191_p2)   ;;  %v2706_v3 = vmov (!%p191_p2), 0   ;;  %v2620_v7 = vld [vmem:[%s3505_s3 + $0xd0] sm:$0xff] (!%p191_p2)   ;;  %p222_p3 = scmp.lt.s32.totalorder (!%p191_p2), %s2229_s19, 1  ;;  %vm416_vm2 = vcmask (!%p191_p2), 1043456  }
   0x6   : > { %194 = sbr.rel (%p191_p2) target bundleno = 393 (0x189), region = 36  ;;  %v2615_v1 = vld [vmem:[%s3505_s3 + $0x80] sm:$0xff] (!%p191_p2)   ;;  %2433 = vmatprep.subr.bf16.mxu1 (!%p191_p2), %v2614_v0  ;;  %293 = vst [vmem:[#allocation2 + $0x8] sm:$0xf] (!%p191_p2), %v2706_v3  ;;  %295 = vst [vmem:[#allocation2 + $0x10] sm:$0xf] (!%p191_p2), %v2706_v3 }
   0x7   : > { %291 = vst [vmem:[#allocation2] sm:$0xf] (!%p191_p2), %v2706_v3  ;;  %292 = vst [vmem:[#allocation2 + $0x4] sm:$0x1] (!%p191_p2), %v2706_v3  ;;  %2434 = vmatpush3.bf16.msra.mxu1 (!%p191_p2), %v2615_v1  ;;  %v2617_v4 = vld [vmem:[%s3505_s3 + $0x88] sm:$0xff] (!%p191_p2)   ;;  %v2618_v5 = vld [vmem:[%s3505_s3 + $0x40] sm:$0xff] (!%p191_p2)  }
   0x8   : > { %294 = vst [vmem:[#allocation2 + $0xc] sm:$0x1] (!%p191_p2), %v2706_v3  ;;  %296 = vst [vmem:[#allocation2 + $0x14] sm:$0x1] (!%p191_p2), %v2706_v3  ;;  %2435 = vmatprep.subr.bf16.mxu1 (!%p191_p2), %v2616_v2  ;;  %v2619_v6 = vld [vmem:[%s3505_s3] sm:$0xff] (!%p191_p2)   ;;  %2393 = vmatprep.subr.bf16.mxu0 (!%p191_p2), %v2618_v5  ;;  %v2621_v8 = vld [vmem:[%s3505_s3 + $0x90] sm:$0xff] (!%p191_p2)  }
   0x9   : > { %297 = vst [vmem:[#allocation2 + $0x18] sm:$0xf] (!%p191_p2), %v2706_v3  ;;  %298 = vst [vmem:[#allocation2 + $0x1c] sm:$0x1] (!%p191_p2), %v2706_v3  ;;  %2394 = vmatpush3.bf16.msra.mxu0 (!%p191_p2), %v2619_v6  ;;  %v2622_v9 = vld [vmem:[%s3505_s3 + $0x48] sm:$0xff] (!%p191_p2)   ;;  %v2624_v11 = vld [vmem:[%s3505_s3 + $0xd8] sm:$0xff] (!%p191_p2)  }
   0xa   : > { %299 = vst [vmem:[#allocation2 + $0x20] sm:$0xf] (!%p191_p2), %v2706_v3  ;;  %300 = vst [vmem:[#allocation2 + $0x24] sm:$0x1] (!%p191_p2), %v2706_v3  ;;  %v2623_v10 = vld [vmem:[%s3505_s3 + $0x8] sm:$0xff] (!%p191_p2)   ;;  %2395 = vmatprep.subr.bf16.mxu0 (!%p191_p2), %v2622_v9  ;;  %v2625_v12 = vld [vmem:[%s3505_s3 + $0x98] sm:$0xff] (!%p191_p2)  }
   0xb   : > { %301 = vst [vmem:[#allocation2 + $0x28] sm:$0xf] (!%p191_p2), %v2706_v3  ;;  %302 = vst [vmem:[#allocation2 + $0x2c] sm:$0x1] (!%p191_p2), %v2706_v3  ;;  %2436 = vmatpush3.bf16.msra.mxu1 (!%p191_p2), %v2617_v4  ;;  %v2626_v13 = vld [vmem:[%s3505_s3 + $0x50] sm:$0xff] (!%p191_p2)   ;;  %v2628_v15 = vld [vmem:[%s3505_s3 + $0xe0] sm:$0xff] (!%p191_p2)  }
   0xc   : > { %303 = vst [vmem:[#allocation2 + $0x30] sm:$0xf] (!%p191_p2), %v2706_v3  ;;  %304 = vst [vmem:[#allocation2 + $0x34] sm:$0x1] (!%p191_p2), %v2706_v3  ;;  %2437 = vmatprep.subr.bf16.mxu1 (!%p191_p2), %v2620_v7  ;;  %v2627_v14 = vld [vmem:[%s3505_s3 + $0x10] sm:$0xff] (!%p191_p2)   ;;  %v2629_v16 = vld [vmem:[%s3505_s3 + $0xa0] sm:$0xff] (!%p191_p2)  }
   0xd   : > { %305 = vst [vmem:[#allocation2 + $0x38] sm:$0xf] %v2706_v3  ;;  %306 = vst [vmem:[#allocation2 + $0x3c] sm:$0x1] %v2706_v3  ;;  %2396 = vmatpush3.bf16.msra.mxu0 %v2623_v10  ;;  %v2630_v17 = vld [vmem:[%s3505_s3 + $0x58] sm:$0xff]   ;;  %v2632_v19 = vld [vmem:[%s3505_s3 + $0xe8] sm:$0xff]  }
   0xe   : > { %307 = vst [vmem:[#allocation2 + $0x40] sm:$0xf] %v2706_v3  ;;  %308 = vst [vmem:[#allocation2 + $0x44] sm:$0x1] %v2706_v3  ;;  %2397 = vmatprep.subr.bf16.mxu0 %v2626_v13  ;;  %v2631_v18 = vld [vmem:[%s3505_s3 + $0x18] sm:$0xff]   ;;  %v2633_v20 = vld [vmem:[%s3505_s3 + $0xa8] sm:$0xff]  }
   0xf   : > { %309 = vst [vmem:[#allocation2 + $0x48] sm:$0xf] %v2706_v3  ;;  %310 = vst [vmem:[#allocation2 + $0x4c] sm:$0x1] %v2706_v3  ;;  %2438 = vmatpush3.bf16.msra.mxu1 %v2621_v8  ;;  %v2634_v21 = vld [vmem:[%s3505_s3 + $0x60] sm:$0xff]   ;;  %s3517_s19 = smov (!%p222_p3, %s2229_s19), 1 }
  0x10   : > { %2439 = vmatprep.subr.bf16.mxu1 %v2624_v11  ;;  %v2635_v22 = vld [vmem:[%s3505_s3 + $0x20] sm:$0xff]   ;;  %v2636_v23 = vld [vmem:[%s3505_s3 + $0xf0] sm:$0xff]   ;;  %v2638_v25 = vld [vmem:[%s3505_s3 + $0x68] sm:$0xff]   ;;  %s2383_s24 = sshll.u32 %s3517_s19, 6  ;;  %vm417_vm0 = vsmask.f32 7938 }
  0x11   : > { %2398 = vmatpush3.bf16.msra.mxu0 %v2627_v14  ;;  %v2637_v24 = vld [vmem:[%s3505_s3 + $0xb0] sm:$0xff]   ;;  %v2639_v26 = vld [vmem:[%s3505_s3 + $0x28] sm:$0xff]   ;;  %v2640_v27 = vld [vmem:[%s3505_s3 + $0xf8] sm:$0xff]   ;;  %s2841_s8 = scalar_lea.vmem %s3502_s0, %s2383_s24  ;;  %vm423_vm1 = vsmask.f32 256  ;;  %vm422_vm3 = vcmask 1040384   ;;  %s231_s17 = scalar_lea.vmem %s3506_s4, %s2383_s24 }
  0x12   : > { %2399 = vmatprep.subr.bf16.mxu0 %v2630_v17  ;;  %v2641_v28 = vld [vmem:[%s3505_s3 + $0xb8] sm:$0xff]   ;;  %v2642_v29 = vld [vmem:[%s3505_s3 + $0x70] sm:$0xff]   ;;  %v237_v31 = vld [vmem:[%s2841_s8] sm:$0xff]  ;;  %vm625_vm6 = vcmask 1042432   ;;  %vm626_vm7 = vcmask 1046532   ;;  %s2238_s24 = sshll.u32 %s3517_s19, 1 }
  0x13   : > { %2440 = vmatpush3.bf16.msra.mxu1 %v2625_v12  ;;  %v2643_v30 = vld [vmem:[%s3505_s3 + $0x30] sm:$0xff]   ;;  %v238_v32 = vld [vmem:[%s2841_s8 + $0x8] sm:$0xff]  ;;  %v2854_v33 = vld [vmem:[%s3503_s1] ss:$0 sm:$0xff]  ;;  %vm486_vm9 = vsmask.f32 3328  ;;  %s235_s21 = scalar_lea.vmem %s3507_s5, %s2238_s24 }
  0x14   : > { %2441 = vmatprep.subr.bf16.mxu1 %v2628_v15  ;;  %v2859_v34 = vld [vmem:[%s3504_s2] ss:$0 sm:$0xff]  ;;  %v253_v35 = vmul.f32 %v2854_v33, %v237_v31  ;;  %v254_v36 = vmul.f32 %v2854_v33, %v238_v32  ;;  %v2647_v44 = vld [vmem:[%s3505_s3 + $0x78] sm:$0xff]   ;;  %vm2875_vm4 = vmand %vm416_vm2, %vm417_vm0  ;;  %vm487_vm10 = vsmask.f32 7440 }
  0x15   : > { %2400 = vmatpush3.bf16.msra.mxu0 %v2631_v18  ;;  %v2645_v41 = vld [vmem:[%s3505_s3 + $0x1c0] sm:$0xff]   ;;  %v2648_v45 = vld [vmem:[%s3505_s3 + $0x38] sm:$0xff]   ;;  %v419_v51 = vld [vmem:[#allocation2 + $0x8] sm:$0xf] }
  0x16   : > { %2401 = vmatprep.subr.bf16.mxu0 %v2634_v21  ;;  %v267_v37 = vadd.f32 %v2859_v34, %v253_v35  ;;  %v268_v38 = vadd.f32 %v2859_v34, %v254_v36  ;;  %v428_v52 = vld [vmem:[#allocation2 + $0x10] sm:$0xf]  ;;  %v425_v53 = vld [vmem:[#allocation2 + $0xc] sm:$0x1]  ;;  %vm2881_vm5 = vmand %vm422_vm3, %vm423_vm1 }
  0x17   : > { %2442 = vmatpush3.bf16.msra.mxu1 %v2629_v16  ;;  %v2885_v57 = vld [vmem:[#allocation2] sm:$0xf]  ;;  %v239_v59 = vld [vmem:[%s2841_s8 + $0x10] sm:$0xff]  ;;  %v240_v0 = vld [vmem:[%s2841_s8 + $0x18] sm:$0xff] }
  0x18   : > { %2443 = vmatprep.subr.bf16.mxu1 %v2632_v19  ;;  %v275_v39 = vmax.f32 %v267_v37, 0.0  ;;  %v276_v40 = vmax.f32 %v268_v38, 0.0  ;;  %v2651_v58 = vld [vmem:[%s3505_s3 + $0x140] sm:$0xff]   ;;  %v255_v3 = vmul.f32 %v2854_v33, %v239_v59  ;;  %v256_v4 = vmul.f32 %v2854_v33, %v240_v0  ;;  %v431_v9 = vld [vmem:[#allocation2 + $0x14] sm:$0x1]  ;;  %vm2906_vm8 = vmor %vm625_vm6, %vm626_vm7 }
  0x19   : > { %2402 = vmatpush3.bf16.msra.mxu0 %v2635_v22  ;;  %v478_v1 = vld [vmem:[#allocation2 + $0x4] sm:$0x1]  ;;  %v601_v2 = vld [vmem:[#allocation2] sm:$0xe]  ;;  %v490_v8 = vshrl.u32 %v2885_v57, 16  ;;  %v493_v10 = vshll.u32 %v2885_v57, 16  ;;  %vm2936_vm11 = vmor %vm486_vm9, %vm487_vm10 }
  0x1a   : > { %2403 = vmatprep.subr.bf16.mxu0 %v2638_v25  ;;  %v2385_v42 = vpack.c.bf16 %v275_v39, %v275_v39  ;;  %v2386_v43 = vpack.c.bf16 %v276_v40, %v276_v40  ;;  %v269_v11 = vadd.f32 %v2859_v34, %v255_v3  ;;  %v270_v12 = vadd.f32 %v2859_v34, %v256_v4  ;;  %v2655_v4 = vld [vmem:[%s3505_s3 + $0x1d0] sm:$0xff]   ;;  %v3403_v56 = vld [vmem:[%s3505_s3 + $0x228] sm:$0xff]  }
  0x1b   : > { %2444 = vmatpush3.bf16.msra.mxu1 %v2633_v20  ;;  %v2249_v14 = vrot.slane %v601_v2, 9  ;;  %v630_v15 = vrot.slane %v478_v1, 5  ;;  %v492_v18 = vrot.slane %v490_v8, 4  ;;  %v495_v19 = vrot.slane %v493_v10, 5  ;;  %v2650_v2 = vld [vmem:[%s3505_s3 + $0x188] sm:$0xff]   ;;  %v241_v10 = vld [vmem:[%s2841_s8 + $0x20] sm:$0xff] }
  0x1c   : > { %2445 = vmatprep.subr.bf16.mxu1 %v2636_v23  ;;  %v336_v46 = vshrl.u32 %v2385_v42, 16  ;;  %v339_v47 = vshll.u32 %v2385_v42, 16  ;;  %v344_v48 = vshrl.u32 %v2386_v43, 16  ;;  %v347_v49 = vshll.u32 %v2386_v43, 16  ;;  %v2646_v43 = vld [vmem:[%s3505_s3 + $0x180] sm:$0xff]  }
  0x1d   : > { %2404 = vmatpush3.bf16.msra.mxu0 %v2639_v26  ;;  %v277_v16 = vmax.f32 %v269_v11, 0.0  ;;  %v278_v17 = vmax.f32 %v270_v12, 0.0  ;;  %v499_v23 = vshll.u32 %v478_v1, 16 }
  0x1e   : > { %2405 = vmatprep.subr.bf16.mxu0 %v2642_v29  ;;  %v338_v54 = vrot.slane %v336_v46, 7  ;;  %v346_v55 = vrot.slane %v344_v48, 7  ;;  %v496_v29 = vor.u32 %v495_v19, %v492_v18 }
  0x1f   : > { %2446 = vmatpush3.bf16.msra.mxu1 %v2637_v24  ;;  %v2387_v20 = vpack.c.bf16 %v277_v16, %v277_v16  ;;  %v2388_v22 = vpack.c.bf16 %v278_v17, %v278_v17  ;;  %v2921_v39 = vrot.slane %v499_v23, 5  ;;  %v443_v16 = vld [vmem:[#allocation2 + $0x24] sm:$0x1] }
  0x20   : > { %2447 = vmatprep.subr.bf16.mxu1 %v2640_v27  ;;  %v341_v60 = vor.u32 %v339_v47, %v338_v54  ;;  %v342_v61 = vrot.slane %v338_v54, 4  ;;  %v349_v62 = vor.u32 %v347_v49, %v346_v55  ;;  %v350_v63 = vrot.slane %v346_v55, 4  ;;  %v437_v54 = vld [vmem:[#allocation2 + $0x1c] sm:$0x1]  ;;  %v2654_v23 = vld [vmem:[%s3505_s3 + $0x100] sm:$0xff]  }
  0x21   : > { %2406 = vmatpush3.bf16.msra.mxu0 %v2643_v30  ;;  %v352_v30 = vshrl.u32 %v2387_v20, 16  ;;  %v360_v37 = vshrl.u32 %v2388_v22, 16  ;;  %v363_v47 = vshll.u32 %v2388_v22, 16 }
  0x22   : > { %2407 = vmatprep.subr.bf16.mxu0 %v2647_v44  ;;  %v420_v5 = vsel %vm2875_vm4, %v341_v60, %v419_v51  ;;  %v429_v6 = vsel %vm2875_vm4, %v349_v62, %v428_v52  ;;  %v426_v7 = vsel %vm2881_vm5, %v342_v61, %v425_v53  ;;  %v432_v13 = vsel %vm2881_vm5, %v350_v63, %v431_v9  ;;  %v2649_v44 = vld [vmem:[%s3505_s3 + $0x1c8] sm:$0xff]   ;;  %v434_v52 = vld [vmem:[#allocation2 + $0x18] sm:$0xf]  ;;  %v440_v53 = vld [vmem:[#allocation2 + $0x20] sm:$0xf] }
  0x23   : > { %2448 = vmatpush3.bf16.msra.mxu1 %v2641_v28  ;;  %421 = vst [vmem:[#allocation2 + $0x8] sm:$0xf] %v420_v5  ;;  %430 = vst [vmem:[#allocation2 + $0x10] sm:$0xf] %v429_v6  ;;  %v631_v28 = vsel %vm2906_vm8, %v2249_v14, %v630_v15  ;;  %v497_v51 = vrot.slane %v496_v29, 4  ;;  %v354_v60 = vrot.slane %v352_v30, 7  ;;  %v257_v29 = vmul.f32 %v2854_v33, %v241_v10 }
  0x24   : > { %2513 = vmatprep.subr.bf16.mxu1 %v2645_v41  ;;  %427 = vst [vmem:[#allocation2 + $0xc] sm:$0x1] %v426_v7  ;;  %433 = vst [vmem:[#allocation2 + $0x14] sm:$0x1] %v432_v13  ;;  %v355_v41 = vshll.u32 %v2387_v20, 16  ;;  %v362_v61 = vrot.slane %v360_v37, 7 }
  0x25   : > { %2408 = vmatpush3.bf16.msra.mxu0 %v2648_v45  ;;  %v358_v7 = vrot.slane %v354_v60, 4  ;;  %v502_v11 = vsel %vm2936_vm11, %v497_v51, %v2921_v39  ;;  %v242_v15 = vld [vmem:[%s2841_s8 + $0x28] sm:$0xff]  ;;  %v2661_v51 = vld [vmem:[%s3505_s3 + $0x150] sm:$0xff]  }
  0x26   : > { %2473 = vmatprep.subr.bf16.mxu0 %v2651_v58  ;;  %v357_v6 = vor.u32 %v355_v41, %v354_v60  ;;  %v365_v8 = vor.u32 %v363_v47, %v362_v61  ;;  %v366_v12 = vrot.slane %v362_v61, 4 }
  0x27   : > { %v438_v20 = vsel %vm2881_vm5, %v358_v7, %v437_v54 }
  0x28   : > { %v435_v18 = vsel %vm2875_vm4, %v357_v6, %v434_v52  ;;  %v441_v19 = vsel %vm2875_vm4, %v365_v8, %v440_v53  ;;  %439 = vst [vmem:[#allocation2 + $0x1c] sm:$0x1] %v438_v20  ;;  %v444_v37 = vsel %vm2881_vm5, %v366_v12, %v443_v16  ;;  %v2669_v20 = vld [vmem:[%s3505_s3 + $0x1e8] sm:$0xff]  }
  0x29   : > { %436 = vst [vmem:[#allocation2 + $0x18] sm:$0xf] %v435_v18  ;;  %442 = vst [vmem:[#allocation2 + $0x20] sm:$0xf] %v441_v19  ;;  %v2667_v19 = vld [vmem:[%s3505_s3 + $0x158] sm:$0xff]  }
  0x2a   : > { %v2910_v24 = vld [vmem:[#allocation2 + $0x8] sm:$0xf]  ;;  %v2912_v25 = vld [vmem:[#allocation2 + $0x10] sm:$0xf]  ;;  %445 = vst [vmem:[#allocation2 + $0x24] sm:$0x1] %v444_v37 }
  0x2b   : > { %v479_v26 = vld [vmem:[#allocation2 + $0xc] sm:$0x1]  ;;  %v602_v27 = vld [vmem:[#allocation2 + $0x8] sm:$0xe]  ;;  %v2285_v31 = vcombine.low %v2910_v24, %v2912_v25  ;;  %v677_v38 = vshrl.u32 %v2910_v24, 16  ;;  %v680_v48 = vshll.u32 %v2910_v24, 16 }
  0x2c   : > { %v2250_v32 = vrot.slane %v602_v27, 9  ;;  %v634_v35 = vrot.slane %v479_v26, 5  ;;  %v2918_v36 = vld [vmem:[#allocation2 + $0x8] sm:$0xf]  ;;  %v513_v40 = vshll.u32 %v479_v26, 16  ;;  %v691_v0 = vshrl.u32 %v2912_v25, 16 }
  0x2d   : > { %1870 = vmatprep.mubr.bf16.mxu1 %v2285_v31  ;;  %v504_v45 = vshrl.u32 %v2918_v36, 16  ;;  %v507_v46 = vshll.u32 %v2918_v36, 16  ;;  %v2940_v62 = vld [vmem:[#allocation2 + $0x10] sm:$0xf]  ;;  %v2942_v63 = vrot.slane %v677_v38, 4  ;;  %v694_v1 = vshll.u32 %v2912_v25, 16 }
  0x2e   : > { %v635_v42 = vsel %vm2906_vm8, %v2250_v32, %v634_v35  ;;  %v515_v3 = vrot.slane %v513_v40, 5  ;;  %v2952_v9 = vld [vmem:[#allocation2 + $0x14] sm:$0x1]  ;;  %v518_v13 = vshrl.u32 %v2940_v62, 16  ;;  %v521_v14 = vshll.u32 %v2940_v62, 16  ;;  %v2657_v32 = vld [vmem:[%s3505_s3 + $0x148] sm:$0xff]  }
  0x2f   : > { %v2281_v49 = vcombine.low %v631_v28, %v635_v42  ;;  %v506_v58 = vrot.slane %v504_v45, 4  ;;  %v509_v59 = vrot.slane %v507_v46, 5  ;;  %v603_v22 = vld [vmem:[#allocation2 + $0x10] sm:$0xe]  ;;  %v527_v28 = vshll.u32 %v2952_v9, 16  ;;  %v2659_v40 = vld [vmem:[%s3505_s3 + $0x1d8] sm:$0xff]  }
  0x30   : > { %v2656_v25 = vld [vmem:[%s3505_s3 + $0x190] sm:$0xff]   ;;  %v520_v26 = vrot.slane %v518_v13, 4  ;;  %v523_v27 = vrot.slane %v521_v14, 5  ;;  %v2273_v31 = vcombine.low %v2885_v57, %v2918_v36  ;;  %v258_v35 = vmul.f32 %v2854_v33, %v242_v15  ;;  %v2660_v57 = vld [vmem:[%s3505_s3 + $0x198] sm:$0xff]  }
  0x31   : > { %1871 = vmatmul.mubr.bf16.vlgmr.msra.gmra.mrb[0].mxu1 %v2281_v49  ;;  %v510_v5 = vor.u32 %v509_v59, %v506_v58  ;;  %v2251_v39 = vrot.slane %v603_v22, 9  ;;  %v271_v42 = vadd.f32 %v2859_v34, %v257_v29  ;;  %v2999_v46 = vrot.slane %v527_v28, 5  ;;  %v2665_v58 = vld [vmem:[%s3505_s3 + $0x1e0] sm:$0xff]   ;;  %v243_v24 = vld [vmem:[%s2841_s8 + $0x30] sm:$0xff]  ;;  %v481_v60 = vld [vmem:[#allocation2 + $0x1c] sm:$0x1] }
  0x32   : > { %2514 = vmatpush3.bf16.msra.mxu1 %v2646_v43  ;;  %v524_v41 = vor.u32 %v523_v27, %v520_v26  ;;  %v272_v36 = vadd.f32 %v2859_v34, %v258_v35  ;;  %v638_v43 = vrot.slane %v2952_v9, 5  ;;  %v3003_v49 = vrot.slane %v680_v48, 5  ;;  %v662_v48 = vld [vmem:[#allocation2 + $0x18] sm:$0xf]  ;;  %v3016_v59 = vld [vmem:[#allocation2 + $0x20] sm:$0xf] }
  0x33   : > { %2515 = vmatprep.subr.bf16.mxu1 %v2649_v44  ;;  %v511_v17 = vrot.slane %v510_v5, 4  ;;  %v2658_v44 = vld [vmem:[%s3505_s3 + $0x108] sm:$0xff]   ;;  %v279_v47 = vmax.f32 %v271_v42, 0.0  ;;  %v3008_v53 = vrot.slane %v691_v0, 4  ;;  %v3010_v54 = vrot.slane %v694_v1, 5  ;;  %v2666_v9 = vld [vmem:[%s3505_s3 + $0x1a0] sm:$0xff]  }
  0x34   : > { %v2997_v45 = vrot.slane %v524_v41, 4  ;;  %v280_v52 = vmax.f32 %v272_v36, 0.0  ;;  %v705_v61 = vshrl.u32 %v662_v48, 16  ;;  %v639_v0 = vsel %vm2906_vm8, %v2251_v39, %v638_v43  ;;  %v3025_v7 = vld [vmem:[#allocation2 + $0x18] sm:$0xf]  ;;  %v2664_v13 = vld [vmem:[%s3505_s3 + $0x110] sm:$0xff]  }
  0x35   : > { %v516_v30 = vsel %vm2936_vm11, %v511_v17, %v515_v3  ;;  %v2389_v3 = vpack.c.bf16 %v279_v47, %v279_v47  ;;  %v642_v6 = vrot.slane %v481_v60, 5  ;;  %v708_v10 = vshll.u32 %v662_v48, 16  ;;  %v244_v22 = vld [vmem:[%s2841_s8 + $0x38] sm:$0xff]  ;;  %v2670_v29 = vld [vmem:[%s3505_s3 + $0x1a8] sm:$0xff]  }
  0x36   : > { %2516 = vmatpush3.bf16.msra.mxu1 %v2650_v2  ;;  %v2277_v38 = vcombine.low %v502_v11, %v516_v30  ;;  %v604_v2 = vld [vmem:[#allocation2 + $0x18] sm:$0xe]  ;;  %v530_v1 = vsel %vm2936_vm11, %v2997_v45, %v2999_v46  ;;  %v2390_v8 = vpack.c.bf16 %v280_v52, %v280_v52  ;;  %v719_v11 = vshrl.u32 %v3016_v59, 16  ;;  %v3055_v30 = vld [vmem:[#allocation2 + $0x20] sm:$0xf] }
  0x37   : > { %2517 = vmatprep.subr.bf16.mxu1 %v2655_v4  ;;  %v2286_v4 = vcombine.low %v662_v48, %v3016_v59  ;;  %v2252_v5 = vrot.slane %v604_v2, 9  ;;  %v722_v12 = vshll.u32 %v3016_v59, 16  ;;  %v259_v14 = vmul.f32 %v2854_v33, %v243_v24  ;;  %v2668_v28 = vld [vmem:[%s3505_s3 + $0x118] sm:$0xff]   ;;  %v449_v39 = vld [vmem:[#allocation2 + $0x2c] sm:$0x1]  ;;  %v2671_v48 = vld [vmem:[%s3505_s3 + $0x160] sm:$0xff]  }
  0x38   : > { %1805 = vmatprep.mubr.bf16.mxu0 %v2277_v38  ;;  %v532_v16 = vshrl.u32 %v3025_v7, 16  ;;  %v535_v17 = vshll.u32 %v3025_v7, 16  ;;  %v541_v18 = vshll.u32 %v481_v60, 16  ;;  %v368_v26 = vshrl.u32 %v2389_v3, 16  ;;  %v446_v38 = vld [vmem:[#allocation2 + $0x28] sm:$0xf] }
  0x39   : > { %1806 = vmatmul.mubr.bf16.vlgmr.msra.gmra.mrb[0].mxu0 %v2273_v31  ;;  %1878 = vmatprep.mubr.bf16.mxu1 %v2286_v4  ;;  %v643_v15 = vsel %vm2906_vm8, %v2252_v5, %v642_v6  ;;  %v371_v27 = vshll.u32 %v2389_v3, 16  ;;  %v376_v35 = vshrl.u32 %v2390_v8, 16  ;;  %v379_v37 = vshll.u32 %v2390_v8, 16  ;;  %v455_v3 = vld [vmem:[#allocation2 + $0x34] sm:$0x1]  ;;  %v3140_v59 = vld [vmem:[%s3505_s3 + $0x200] sm:$0xff]  }
  0x3a   : > { %2518 = vmatpush3.bf16.msra.mxu1 %v2656_v25  ;;  %2474 = vmatpush3.bf16.msra.mxu0 %v2654_v23  ;;  %v3047_v23 = vrot.slane %v705_v61, 4  ;;  %v2282_v25 = vcombine.low %v639_v0, %v643_v15  ;;  %v534_v31 = vrot.slane %v532_v16, 4  ;;  %v3059_v41 = vrot.slane %v708_v10, 5  ;;  %v2674_v0 = vld [vmem:[%s3505_s3 + $0x120] sm:$0xff]  }
  0x3b   : > { %2519 = vmatprep.subr.bf16.mxu1 %v2659_v40  ;;  %2475 = vmatprep.subr.bf16.mxu0 %v2657_v32  ;;  %v537_v32 = vrot.slane %v535_v17, 5  ;;  %v3057_v40 = vld [vmem:[#allocation2 + $0x20] sm:$0xe]  ;;  %v370_v42 = vrot.slane %v368_v26, 7  ;;  %v546_v36 = vshrl.u32 %v3055_v30, 16  ;;  %v260_v43 = vmul.f32 %v2854_v33, %v244_v22  ;;  %v2677_v17 = vld [vmem:[%s3505_s3 + $0x168] sm:$0xff]  }
  0x3c   : > { %1879 = vmatmul.mubr.bf16.gmra.mrb[4].mxu1 %v2282_v25  ;;  %v378_v52 = vrot.slane %v376_v35, 7  ;;  %v549_v24 = vshll.u32 %v3055_v30, 16  ;;  %v2253_v33 = vrot.slane %v3057_v40, 9  ;;  %v273_v16 = vadd.f32 %v2859_v34, %v259_v14  ;;  %v2683_v40 = vld [vmem:[%s3505_s3 + $0x130] sm:$0xff]  }
  0x3d   : > { %v538_v47 = vor.u32 %v537_v32, %v534_v31  ;;  %v373_v60 = vor.u32 %v371_v27, %v370_v42  ;;  %v374_v61 = vrot.slane %v370_v42, 4  ;;  %v548_v2 = vrot.slane %v546_v36, 4  ;;  %v2681_v31 = vld [vmem:[%s3505_s3 + $0x170] sm:$0xff]  }
  0x3e   : > { %2520 = vmatpush3.bf16.msra.mxu1 %v2660_v57  ;;  %2476 = vmatpush3.bf16.msra.mxu0 %v2658_v44  ;;  %v452_v57 = vld [vmem:[#allocation2 + $0x30] sm:$0xf]  ;;  %v381_v5 = vor.u32 %v379_v37, %v378_v52  ;;  %v382_v6 = vrot.slane %v378_v52, 4  ;;  %v551_v8 = vrot.slane %v549_v24, 5  ;;  %v274_v22 = vadd.f32 %v2859_v34, %v260_v43  ;;  %v2678_v34 = vld [vmem:[%s3505_s3 + $0x128] sm:$0xff]  }
  0x3f   : > { %2521 = vmatprep.subr.bf16.mxu1 %v2665_v58  ;;  %2477 = vmatprep.subr.bf16.mxu0 %v2661_v51  ;;  %v2675_v44 = vld [vmem:[%s3505_s3 + $0x1f0] sm:$0xff]   ;;  %v543_v51 = vrot.slane %v541_v18, 5  ;;  %v3066_v58 = vld [vmem:[#allocation2 + $0x24] sm:$0x1]  ;;  %v539_v4 = vrot.slane %v538_v47, 4  ;;  %v447_v10 = vsel %vm2875_vm4, %v373_v60, %v446_v38  ;;  %v281_v25 = vmax.f32 %v273_v16, 0.0 }
  0x40   : > { %v555_v15 = vshll.u32 %v3066_v58, 16  ;;  %448 = vst [vmem:[#allocation2 + $0x28] sm:$0xf] %v447_v10  ;;  %v456_v26 = vsel %vm2881_vm5, %v382_v6, %v455_v3  ;;  %v282_v27 = vmax.f32 %v274_v22, 0.0  ;;  %v646_v45 = vrot.slane %v3066_v58, 5 }
  0x41   : > { %v544_v18 = vsel %vm2936_vm11, %v539_v4, %v543_v51  ;;  %457 = vst [vmem:[#allocation2 + $0x34] sm:$0x1] %v456_v26  ;;  %v3109_v46 = vpack.c.bf16 %v281_v25, %v281_v25  ;;  %v3125_v32 = vrot.slane %v722_v12, 5  ;;  %v683_v12 = vor.u32 %v3003_v49, %v2942_v63  ;;  %v464_v26 = vld [vmem:[#allocation2 + $0x40] sm:$0xf] }
  0x42   : > { %2522 = vmatpush3.bf16.msra.mxu1 %v2666_v9  ;;  %2478 = vmatpush3.bf16.msra.mxu0 %v2664_v13  ;;  %v2676_v9 = vld [vmem:[%s3505_s3 + $0x1b0] sm:$0xff]   ;;  %v450_v13 = vsel %vm2881_vm5, %v374_v61, %v449_v39  ;;  %v2278_v14 = vcombine.low %v530_v1, %v544_v18  ;;  %v2680_v1 = vld [vmem:[%s3505_s3 + $0x1b8] sm:$0xff]   ;;  %v3127_v35 = vrot.slane %v555_v15, 5  ;;  %v697_v42 = vor.u32 %v3010_v54, %v3008_v53 }
  0x43   : > { %2479 = vmatprep.subr.bf16.mxu0 %v2667_v19  ;;  %2523 = vmatprep.subr.bf16.mxu1 %v2669_v20  ;;  %v2274_v19 = vcombine.low %v2940_v62, %v3025_v7  ;;  %v453_v20 = vsel %vm2875_vm4, %v381_v5, %v452_v57  ;;  %451 = vst [vmem:[#allocation2 + $0x2c] sm:$0x1] %v450_v13  ;;  %v2679_v62 = vld [vmem:[%s3505_s3 + $0x1f8] sm:$0xff]   ;;  %v387_v38 = vshll.u32 %v3109_v46, 16 }
  0x44   : > { %454 = vst [vmem:[#allocation2 + $0x30] sm:$0xf] %v453_v20  ;;  %v552_v7 = vor.u32 %v551_v8, %v548_v2  ;;  %1813 = vmatprep.mubr.bf16.mxu0 %v2278_v14  ;;  %v711_v47 = vor.u32 %v3059_v41, %v3047_v23 }
  0x45   : > { %1814 = vmatmul.mubr.bf16.gmra.mrb[4].mxu0 %v2274_v19  ;;  %v2687_v19 = vld [vmem:[%s3505_s3 + $0x138] sm:$0xff]  }
  0x46   : > { %2524 = vmatpush3.bf16.msra.mxu1 %v2670_v29  ;;  %2480 = vmatpush3.bf16.msra.mxu0 %v2668_v28  ;;  %v3116_v28 = vrot.slane %v719_v11, 4  ;;  %v3118_v29 = vpack.c.bf16 %v282_v27, %v282_v27  ;;  %v3129_v37 = vrot.slane %v552_v7, 4  ;;  %v384_v11 = vshrl.u32 %v3109_v46, 16 }
  0x47   : > { %2525 = vmatprep.subr.bf16.mxu1 %v2675_v44  ;;  %2481 = vmatprep.subr.bf16.mxu0 %v2671_v48  ;;  %v664_v57 = vld [vmem:[#allocation2 + $0x28] sm:$0xf]  ;;  %v647_v44 = vsel %vm2906_vm8, %v2253_v33, %v646_v45  ;;  %v2686_v33 = vld [vmem:[%s3505_s3 + $0x178] sm:$0xff]  }
  0x48   : > { %v392_v39 = vshrl.u32 %v3118_v29, 16  ;;  %v606_v43 = vld [vmem:[#allocation2 + $0x28] sm:$0xe]  ;;  %v733_v52 = vshrl.u32 %v664_v57, 16  ;;  %v736_v58 = vshll.u32 %v664_v57, 16  ;;  %v395_v8 = vshll.u32 %v3118_v29, 16 }
  0x49   : > { %v2254_v24 = vrot.slane %v606_v43, 9  ;;  %v386_v25 = vrot.slane %v384_v11, 7  ;;  %v558_v11 = vsel %vm2936_vm11, %v3129_v37, %v3127_v35  ;;  %v3188_v43 = vld [vmem:[#allocation2 + $0x18] sm:$0xf] }
  0x4a   : > { %2526 = vmatpush3.bf16.msra.mxu1 %v2676_v9  ;;  %2482 = vmatpush3.bf16.msra.mxu0 %v2674_v0  ;;  %v483_v36 = vld [vmem:[#allocation2 + $0x2c] sm:$0x1]  ;;  %v3151_v0 = vld [vmem:[#allocation2 + $0x28] sm:$0xf]  ;;  %v3156_v4 = vrot.slane %v733_v52, 4  ;;  %v3164_v10 = vrot.slane %v736_v58, 5 }
  0x4b   : > { %2483 = vmatprep.subr.bf16.mxu0 %v2677_v17  ;;  %2527 = vmatprep.subr.bf16.mxu1 %v2679_v62  ;;  %v665_v51 = vld [vmem:[#allocation2 + $0x30] sm:$0xf]  ;;  %v650_v48 = vrot.slane %v483_v36, 5  ;;  %v569_v3 = vshll.u32 %v483_v36, 16  ;;  %v560_v6 = vshrl.u32 %v3151_v0, 16  ;;  %v563_v16 = vshll.u32 %v3151_v0, 16 }
  0x4c   : > { %v747_v60 = vshrl.u32 %v665_v51, 16  ;;  %v750_v61 = vshll.u32 %v665_v51, 16  ;;  %v2287_v2 = vcombine.low %v664_v57, %v665_v51  ;;  %v3162_v9 = vld [vmem:[#allocation2 + $0x34] sm:$0x1]  ;;  %v458_v17 = vld [vmem:[#allocation2 + $0x38] sm:$0xf] }
  0x4d   : > { %v651_v5 = vsel %vm2906_vm8, %v2254_v24, %v650_v48  ;;  %v607_v18 = vld [vmem:[#allocation2 + $0x30] sm:$0xe]  ;;  %v562_v22 = vrot.slane %v560_v6, 4  ;;  %v571_v14 = vrot.slane %v569_v3, 5  ;;  %v565_v7 = vrot.slane %v563_v16, 5 }
  0x4e   : > { %2528 = vmatpush3.bf16.msra.mxu1 %v2680_v1  ;;  %2484 = vmatpush3.bf16.msra.mxu0 %v2678_v34  ;;  %v3166_v13 = vrot.slane %v747_v60, 4  ;;  %v2283_v15 = vcombine.low %v647_v44, %v651_v5  ;;  %v3172_v20 = vrot.slane %v750_v61, 5  ;;  %v3174_v62 = vld [vmem:[#allocation2 + $0x30] sm:$0xf]  ;;  %v3176_v27 = vrot.slane %v392_v39, 7 }
  0x4f   : > { %2485 = vmatprep.subr.bf16.mxu0 %v2681_v31  ;;  %2589 = vmatprep.subr.bf16.mxu1 %v3140_v59  ;;  %v461_v34 = vld [vmem:[#allocation2 + $0x3c] sm:$0x1]  ;;  %v2255_v45 = vrot.slane %v607_v18, 9  ;;  %v654_v46 = vrot.slane %v3162_v9, 5  ;;  %v389_v1 = vor.u32 %v387_v38, %v386_v25  ;;  %v390_v29 = vrot.slane %v386_v25, 4 }
  0x50   : > { %1886 = vmatprep.mubr.bf16.mxu1 %v2287_v2  ;;  %v574_v31 = vshrl.u32 %v3174_v62, 16  ;;  %v3181_v57 = vld [vmem:[#allocation2 + $0x10] sm:$0xf]  ;;  %v566_v36 = vor.u32 %v565_v7, %v562_v22  ;;  %v397_v39 = vor.u32 %v395_v8, %v3176_v27  ;;  %v3190_v44 = vld [vmem:[#allocation2 + $0x14] sm:$0x1]  ;;  %v725_v38 = vor.u32 %v3125_v32, %v3116_v28 }
  0x51   : > { %1887 = vmatmul.mubr.bf16.gmra.mrb[8].mxu1 %v2283_v15  ;;  %v459_v51 = vsel %vm2875_vm4, %v389_v1, %v458_v17  ;;  %v462_v52 = vsel %vm2881_vm5, %v390_v29, %v461_v34  ;;  %v583_v48 = vshll.u32 %v3162_v9, 16  ;;  %v862_v28 = vshrl.u32 %v3181_v57, 16  ;;  %v3205_v61 = vld [vmem:[#allocation2 + $0x1c] sm:$0x1]  ;;  %v669_v25 = vld [vmem:[#allocation2 + $0x14] sm:$0x1] }
  0x52   : > { %2486 = vmatpush3.bf16.msra.mxu0 %v2683_v40  ;;  %v577_v40 = vshll.u32 %v3174_v62, 16  ;;  %v576_v58 = vrot.slane %v574_v31, 4  ;;  %v567_v35 = vrot.slane %v566_v36, 4  ;;  %460 = vst [vmem:[#allocation2 + $0x38] sm:$0xf] %v459_v51  ;;  %v465_v37 = vsel %vm2875_vm4, %v397_v39, %v464_v26 }
  0x53   : > { %2487 = vmatprep.subr.bf16.mxu0 %v2686_v33  ;;  %463 = vst [vmem:[#allocation2 + $0x3c] sm:$0x1] %v462_v52  ;;  %v2275_v32 = vcombine.low %v3055_v30, %v3151_v0  ;;  %466 = vst [vmem:[#allocation2 + $0x40] sm:$0xf] %v465_v37  ;;  %v865_v2 = vshll.u32 %v3181_v57, 16  ;;  %v876_v3 = vshrl.u32 %v3188_v43, 16  ;;  %v655_v22 = vsel %vm2906_vm8, %v2255_v45, %v654_v46 }
  0x54   : > { %v579_v24 = vrot.slane %v577_v40, 5  ;;  %v572_v50 = vsel %vm2936_vm11, %v567_v35, %v571_v14  ;;  %v3211_v33 = vrot.slane %v583_v48, 5  ;;  %v871_v5 = vshll.u32 %v3190_v44, 16  ;;  %v788_v37 = vld [vmem:[#allocation2 + $0x8] sm:$0xe] }
  0x55   : > { %v879_v6 = vshll.u32 %v3188_v43, 16  ;;  %v2279_v8 = vcombine.low %v558_v11, %v572_v50  ;;  %v864_v30 = vrot.slane %v862_v28, 4  ;;  %v867_v0 = vrot.slane %v865_v2, 5  ;;  %v789_v2 = vld [vmem:[#allocation2 + $0x10] sm:$0xe] }
  0x56   : > { %2488 = vmatpush3.bf16.msra.mxu0 %v2687_v19  ;;  %v580_v60 = vor.u32 %v579_v24, %v576_v58  ;;  %v3220_v15 = vrot.slane %v683_v12, 4  ;;  %v3225_v16 = vrot.slane %v697_v42, 4  ;;  %v878_v17 = vrot.slane %v876_v3, 4  ;;  %v668_v42 = vld [vmem:[#allocation2 + $0xc] sm:$0x1] }
  0x57   : > { %2565 = vmatprep.subr.bf16.mxu0 %v3140_v59  ;;  %v881_v18 = vrot.slane %v879_v6, 5  ;;  %1821 = vmatprep.mubr.bf16.mxu0 %v2279_v8  ;;  %v398_v19 = vrot.slane %v3176_v27, 4  ;;  %v3233_v14 = vrot.slane %v711_v47, 4  ;;  %v3235_v63 = vrot.slane %v725_v38, 4  ;;  %v3263_v8 = vld [vmem:[#allocation2 + $0x20] sm:$0xf] }
  0x58   : > { %v3215_v9 = vrot.slane %v580_v60, 4  ;;  %1822 = vmatmul.mubr.bf16.gmra.mrb[8].mxu0 %v2275_v32  ;;  %v873_v53 = vrot.slane %v871_v5, 5  ;;  %v885_v54 = vshll.u32 %v3205_v61, 16  ;;  %v2297_v12 = vcombine.low %v3181_v57, %v3188_v43 }
  0x59   : > { %v666_v26 = vld [vmem:[#allocation2 + $0x38] sm:$0xf]  ;;  %v868_v47 = vor.u32 %v867_v0, %v864_v30  ;;  %v882_v7 = vor.u32 %v881_v18, %v878_v17  ;;  %v739_v34 = vor.u32 %v3164_v10, %v3156_v4  ;;  %v753_v45 = vor.u32 %v3172_v20, %v3166_v13 }
  0x5a   : > { %v586_v49 = vsel %vm2936_vm11, %v3215_v9, %v3211_v33  ;;  %v485_v23 = vld [vmem:[#allocation2 + $0x3c] sm:$0x1]  ;;  %v608_v41 = vld [vmem:[#allocation2 + $0x38] sm:$0xe]  ;;  %v3248_v46 = vld [vmem:[#allocation2 + $0x40] sm:$0xf] }
  0x5b   : > { %v761_v1 = vshrl.u32 %v666_v26, 16  ;;  %v764_v29 = vshll.u32 %v666_v26, 16  ;;  %v2256_v31 = vrot.slane %v608_v41, 9  ;;  %v658_v40 = vrot.slane %v485_v23, 5  ;;  %v3251_v36 = vld [vmem:[#allocation2 + $0x38] sm:$0xf] }
  0x5c   : > { %v2288_v11 = vcombine.low %v666_v26, %v3248_v46  ;;  %v597_v39 = vshll.u32 %v485_v23, 16  ;;  %v686_v38 = vshll.u32 %v668_v42, 16  ;;  %v700_v51 = vshll.u32 %v669_v25, 16  ;;  %v3267_v26 = vld [vmem:[#allocation2 + $0x24] sm:$0x1] }
  0x5d   : > { %v775_v52 = vshrl.u32 %v3248_v46, 16  ;;  %v659_v58 = vsel %vm2906_vm8, %v2256_v31, %v658_v40  ;;  %v588_v24 = vshrl.u32 %v3251_v36, 16  ;;  %v887_v35 = vrot.slane %v885_v54, 5  ;;  %v3265_v54 = vld [vmem:[#allocation2 + $0x28] sm:$0xf] }
  0x5e   : > { %v3257_v48 = vrot.slane %v761_v1, 4  ;;  %v778_v28 = vshll.u32 %v3248_v46, 16  ;;  %1894 = vmatprep.mubr.bf16.mxu1 %v2288_v11  ;;  %v2284_v32 = vcombine.low %v655_v22, %v659_v58  ;;  %v591_v60 = vshll.u32 %v3251_v36, 16  ;;  %v3281_v11 = vld [vmem:[#allocation2 + $0x2c] sm:$0x1] }
  0x5f   : > { %v3261_v3 = vrot.slane %v764_v29, 5  ;;  %v590_v50 = vrot.slane %v588_v24, 4  ;;  %v599_v5 = vrot.slane %v597_v39, 5  ;;  %v869_v6 = vrot.slane %v868_v47, 4 }
  0x60   : > { %1895 = vmatmul.mubr.bf16.gmra.mrb[12].mxu1 %v2284_v32  ;;  %v593_v30 = vrot.slane %v591_v60, 5  ;;  %v883_v0 = vrot.slane %v882_v7, 4  ;;  %v688_v17 = vrot.slane %v686_v38, 5  ;;  %v702_v18 = vrot.slane %v700_v51, 5  ;;  %v670_v51 = vld [vmem:[#allocation2 + $0x1c] sm:$0x1] }
  0x61   : > { %v874_v22 = vsel %vm2936_vm11, %v869_v6, %v873_v53  ;;  %v2257_v23 = vrot.slane %v788_v37, 9  ;;  %v814_v41 = vrot.slane %v668_v42, 5  ;;  %v2258_v46 = vrot.slane %v789_v2, 9  ;;  %v790_v37 = vld [vmem:[#allocation2 + $0x18] sm:$0xe]  ;;  %v3298_v60 = vld [vmem:[%s3505_s3 + $0x208] sm:$0xff]  }
  0x62   : > { %v594_v1 = vor.u32 %v593_v30, %v590_v50  ;;  %v888_v47 = vsel %vm2936_vm11, %v883_v0, %v887_v35  ;;  %v818_v29 = vrot.slane %v669_v25, 5  ;;  %v689_v7 = vsel %vm2936_vm11, %v3220_v15, %v688_v17  ;;  %v671_v17 = vld [vmem:[#allocation2 + $0x24] sm:$0x1] }
  0x63   : > { %v2301_v31 = vcombine.low %v874_v22, %v888_v47  ;;  %v815_v40 = vsel %vm2906_vm8, %v2257_v23, %v814_v41  ;;  %v703_v53 = vsel %vm2936_vm11, %v3225_v16, %v702_v18  ;;  %v890_v42 = vshrl.u32 %v3263_v8, 16 }
  0x64   : > { %v595_v39 = vrot.slane %v594_v1, 4  ;;  %v819_v25 = vsel %vm2906_vm8, %v2258_v46, %v818_v29  ;;  %v3286_v38 = vcombine.low %v689_v7, %v703_v53  ;;  %v893_v15 = vshll.u32 %v3263_v8, 16  ;;  %v3317_v1 = vld [vmem:[#allocation2 + $0x38] sm:$0xf] }
  0x65   : > { %v2276_v58 = vcombine.low %v3174_v62, %v3251_v36  ;;  %2000 = vmatprep.mubr.bf16.mxu1 %v2301_v31  ;;  %v892_v24 = vrot.slane %v890_v42, 4  ;;  %v899_v16 = vshll.u32 %v3267_v26, 16  ;;  %v904_v35 = vshrl.u32 %v3265_v54, 16  ;;  %v791_v36 = vld [vmem:[#allocation2 + $0x20] sm:$0xe] }
  0x66   : > { %v600_v32 = vsel %vm2936_vm11, %v595_v39, %v599_v5  ;;  %v895_v2 = vrot.slane %v893_v15, 5  ;;  %v907_v50 = vshll.u32 %v3265_v54, 16  ;;  %v913_v62 = vshll.u32 %v3281_v11, 16 }
  0x67   : > { %v3302_v6 = vrot.slane %v775_v52, 4  ;;  %v2280_v30 = vcombine.low %v586_v49, %v600_v32  ;;  %v2293_v5 = vcombine.low %v815_v40, %v819_v25  ;;  %v906_v0 = vrot.slane %v904_v35, 4  ;;  %v3314_v52 = vld [vmem:[#allocation2 + $0x30] sm:$0xf] }
  0x68   : > { %v3309_v18 = vrot.slane %v778_v28, 5  ;;  %2001 = vmatmul.mubr.bf16.vlgmr.msra.gmra.mrb[16].mxu1 %v2297_v12  ;;  %v896_v22 = vor.u32 %v895_v2, %v892_v24  ;;  %v901_v23 = vrot.slane %v899_v16, 5  ;;  %v909_v41 = vrot.slane %v907_v50, 5  ;;  %v3319_v28 = vld [vmem:[#allocation2 + $0x34] sm:$0x1] }
  0x69   : > { %1829 = vmatprep.mubr.bf16.mxu0 %v2280_v30  ;;  %2597 = vmatpush3.bf16.msra.mxu1 %v3140_v59  ;;  %v915_v46 = vrot.slane %v913_v62, 5  ;;  %v2259_v33 = vrot.slane %v790_v37, 9  ;;  %v822_v9 = vrot.slane %v670_v51, 5  ;;  %v2260_v49 = vrot.slane %v791_v36, 9  ;;  %v3325_v12 = vld [vmem:[%s3505_s3 + $0x210] sm:$0xff]   ;;  %v3351_v36 = vld [vmem:[%s3505_s3 + $0x218] sm:$0xff]  }
  0x6a   : > { %1830 = vmatmul.mubr.bf16.gmra.mrb[12].mxu0 %v2276_v58  ;;  %2590 = vmatprep.subr.bf16.mxu1 %v3298_v60  ;;  %v897_v57 = vrot.slane %v896_v22, 4  ;;  %v910_v43 = vor.u32 %v909_v41, %v906_v0  ;;  %v826_v47 = vrot.slane %v671_v17, 5  ;;  %v714_v29 = vshll.u32 %v670_v51, 16  ;;  %v672_v2 = vld [vmem:[#allocation2 + $0x2c] sm:$0x1] }
  0x6b   : > { %1935 = vmatprep.mubr.bf16.mxu0 %v2293_v5  ;;  %v2298_v7 = vcombine.low %v3263_v8, %v3265_v54  ;;  %v728_v31 = vshll.u32 %v671_v17, 16  ;;  %v918_v40 = vshrl.u32 %v3314_v52, 16  ;;  %v921_v53 = vshll.u32 %v3314_v52, 16  ;;  %v3338_v8 = vld [vmem:[#allocation2 + $0x3c] sm:$0x1] }
  0x6c   : > { %v902_v42 = vsel %vm2936_vm11, %v897_v57, %v901_v23  ;;  %v911_v39 = vrot.slane %v910_v43, 4  ;;  %v823_v25 = vsel %vm2906_vm8, %v2259_v33, %v822_v9  ;;  %v716_v15 = vrot.slane %v714_v29, 5  ;;  %v792_v50 = vld [vmem:[#allocation2 + $0x28] sm:$0xe]  ;;  %v793_v17 = vld [vmem:[#allocation2 + $0x30] sm:$0xe] }
  0x6d   : > { %2598 = vmatpush3.bf16.msra.mxu1 %v3298_v60  ;;  %v827_v51 = vsel %vm2906_vm8, %v2260_v49, %v826_v47  ;;  %v730_v58 = vrot.slane %v728_v31, 5  ;;  %v920_v54 = vrot.slane %v918_v40, 4  ;;  %v923_v24 = vrot.slane %v921_v53, 5  ;;  %v467_v33 = vld [vmem:[#allocation2 + $0x44] sm:$0x1] }
  0x6e   : > { %v916_v16 = vsel %vm2936_vm11, %v911_v39, %v915_v46  ;;  %2591 = vmatprep.subr.bf16.mxu1 %v3325_v12  ;;  %v717_v35 = vsel %vm2936_vm11, %v3233_v14, %v716_v15  ;;  %v927_v37 = vshll.u32 %v3319_v28, 16  ;;  %v932_v32 = vshrl.u32 %v3317_v1, 16  ;;  %v673_v14 = vld [vmem:[#allocation2 + $0x34] sm:$0x1]  ;;  %v3364_v47 = vld [vmem:[#allocation2 + $0x40] sm:$0xf] }
  0x6f   : > { %v2302_v62 = vcombine.low %v902_v42, %v916_v16  ;;  %v731_v30 = vsel %vm2936_vm11, %v3235_v63, %v730_v58  ;;  %v924_v5 = vor.u32 %v923_v24, %v920_v54  ;;  %v935_v0 = vshll.u32 %v3317_v1, 16  ;;  %v3362_v63 = vld [vmem:[%s3505_s3 + $0x220] sm:$0xff]   ;;  %v3366_v29 = vld [vmem:[#allocation2 + $0x48] sm:$0xf]  ;;  %v3369_v39 = vld [vmem:[#allocation2 + $0x4c] sm:$0x1] }
  0x70   : > { %v2294_v22 = vcombine.low %v823_v25, %v827_v51  ;;  %v929_v23 = vrot.slane %v927_v37, 5  ;;  %v934_v41 = vrot.slane %v932_v32, 4  ;;  %v941_v46 = vshll.u32 %v3338_v8, 16 }
  0x71   : > { %2008 = vmatprep.mubr.bf16.mxu1 %v2302_v62  ;;  %2599 = vmatpush3.bf16.msra.mxu1 %v3325_v12  ;;  %v2290_v9 = vcombine.low %v717_v35, %v731_v30  ;;  %v925_v49 = vrot.slane %v924_v5, 4  ;;  %v937_v57 = vrot.slane %v935_v0, 5  ;;  %v2261_v43 = vrot.slane %v792_v50, 9  ;;  %v794_v35 = vld [vmem:[#allocation2 + $0x38] sm:$0xe] }
  0x72   : > { %1936 = vmatmul.mubr.bf16.vlgmr.msra.gmra.mrb[16].mxu0 %v3286_v38  ;;  %2009 = vmatmul.mubr.bf16.gmra.mrb[20].mxu1 %v2298_v7  ;;  %v943_v31 = vrot.slane %v941_v46, 5  ;;  %v830_v40 = vrot.slane %v672_v2, 5  ;;  %v2262_v53 = vrot.slane %v793_v17, 9  ;;  %v834_v42 = vrot.slane %v673_v14, 5  ;;  %v674_v50 = vld [vmem:[#allocation2 + $0x3c] sm:$0x1] }
  0x73   : > { %2566 = vmatpush3.bf16.msra.mxu0 %v3140_v59  ;;  %2592 = vmatprep.subr.bf16.mxu1 %v3351_v36  ;;  %v938_v25 = vor.u32 %v937_v57, %v934_v41  ;;  %v2299_v15 = vcombine.low %v3314_v52, %v3317_v1  ;;  %v740_v51 = vrot.slane %v739_v34, 4  ;;  %v742_v38 = vshll.u32 %v672_v2, 16  ;;  %v795_v62 = vld [vmem:[#allocation2 + $0x40] sm:$0xe]  ;;  %v977_v17 = vld [vmem:[#allocation2 + $0x30] sm:$0xe] }
  0x74   : > { %2567 = vmatprep.subr.bf16.mxu0 %v3298_v60  ;;  %1943 = vmatprep.mubr.bf16.mxu0 %v2294_v22  ;;  %v930_v7 = vsel %vm2936_vm11, %v925_v49, %v929_v23  ;;  %v831_v59 = vsel %vm2906_vm8, %v2261_v43, %v830_v40  ;;  %v754_v58 = vrot.slane %v753_v45, 4  ;;  %v756_v54 = vshll.u32 %v673_v14, 16  ;;  %v3417_v46 = vld [vmem:[%s3505_s3 + $0x230] sm:$0xff]   ;;  %v3427_v40 = vld [vmem:[%s3505_s3 + $0x238] sm:$0xff]  }
  0x75   : > { %2600 = vmatpush3.bf16.msra.mxu1 %v3351_v36  ;;  %v939_v52 = vrot.slane %v938_v25, 4  ;;  %v835_v4 = vsel %vm2906_vm8, %v2262_v53, %v834_v42  ;;  %v744_v10 = vrot.slane %v742_v38, 5  ;;  %v468_v34 = vsel %vm2881_vm5, %v398_v19, %v467_v33  ;;  %v978_v42 = vld [vmem:[#allocation2 + $0x38] sm:$0xe] }
  0x76   : > { %2593 = vmatprep.subr.bf16.mxu1 %v3362_v63  ;;  %v758_v1 = vrot.slane %v756_v54, 5  ;;  %469 = vst [vmem:[#allocation2 + $0x44] sm:$0x1] %v468_v34  ;;  %v946_v13 = vshrl.u32 %v3364_v47, 16  ;;  %v949_v20 = vshll.u32 %v3364_v47, 16  ;;  %v960_v45 = vshrl.u32 %v3366_v29, 16 }
  0x77   : > { %2568 = vmatpush3.bf16.msra.mxu0 %v3298_v60  ;;  %v944_v24 = vsel %vm2936_vm11, %v939_v52, %v943_v31  ;;  %v745_v27 = vsel %vm2936_vm11, %v740_v51, %v744_v10  ;;  %v963_v19 = vshll.u32 %v3366_v29, 16  ;;  %v969_v16 = vshll.u32 %v3369_v39, 16  ;;  %v980_v52 = vld [vmem:[#allocation2 + $0x48] sm:$0xe]  ;;  %v973_v34 = vld [vmem:[#allocation2 + $0x10] sm:$0xe] }
  0x78   : > { %2569 = vmatprep.subr.bf16.mxu0 %v3325_v12  ;;  %v2303_v37 = vcombine.low %v930_v7, %v944_v24  ;;  %v759_v60 = vsel %vm2936_vm11, %v754_v58, %v758_v1  ;;  %v948_v32 = vrot.slane %v946_v13, 4  ;;  %v951_v2 = vrot.slane %v949_v20, 5 }
  0x79   : > { %2601 = vmatpush3.bf16.msra.mxu1 %v3362_v63  ;;  %v2295_v30 = vcombine.low %v831_v59, %v835_v4  ;;  %v2291_v5 = vcombine.low %v745_v27, %v759_v60  ;;  %v962_v0 = vrot.slane %v960_v45, 4  ;;  %v965_v14 = vrot.slane %v963_v19, 5  ;;  %v979_v59 = vld [vmem:[#allocation2 + $0x40] sm:$0xe] }
  0x7a   : > { %1944 = vmatmul.mubr.bf16.gmra.mrb[20].mxu0 %v2290_v9  ;;  %2016 = vmatprep.mubr.bf16.mxu1 %v2303_v37  ;;  %v952_v22 = vor.u32 %v951_v2, %v948_v32  ;;  %v971_v23 = vrot.slane %v969_v16, 5  ;;  %v1027_v41 = vrot.slane %v3369_v39, 5  ;;  %v2263_v33 = vrot.slane %v794_v35, 9  ;;  %v974_v37 = vld [vmem:[#allocation2 + $0x18] sm:$0xe] }
  0x7b   : > { %2570 = vmatpush3.bf16.msra.mxu0 %v3325_v12  ;;  %2017 = vmatmul.mubr.bf16.gmra.mrb[24].mxu1 %v2299_v15  ;;  %v966_v49 = vor.u32 %v965_v14, %v962_v0  ;;  %v838_v57 = vrot.slane %v674_v50, 5  ;;  %v2264_v43 = vrot.slane %v795_v62, 9  ;;  %v767_v9 = vor.u32 %v3261_v3, %v3257_v48 }
  0x7c   : > { %2571 = vmatprep.subr.bf16.mxu0 %v3351_v36  ;;  %2594 = vmatprep.subr.bf16.mxu1 %v3403_v56  ;;  %v953_v31 = vrot.slane %v952_v22, 4  ;;  %v770_v53 = vshll.u32 %v674_v50, 16  ;;  %v781_v12 = vor.u32 %v3309_v18, %v3302_v6  ;;  %v2269_v25 = vrot.slane %v977_v17, 9 }
  0x7d   : > { %2602 = vmatpush3.bf16.msra.mxu1 %v3403_v56  ;;  %1951 = vmatprep.mubr.bf16.mxu0 %v2295_v30  ;;  %v859_v48 = vld [vmem:[#allocation2 + $0x44] sm:$0x1]  ;;  %v967_v3 = vrot.slane %v966_v49, 4  ;;  %v2300_v15 = vcombine.low %v3364_v47, %v3366_v29  ;;  %v839_v38 = vsel %vm2906_vm8, %v2263_v33, %v838_v57  ;;  %v768_v7 = vrot.slane %v767_v9, 4  ;;  %v975_v30 = vld [vmem:[#allocation2 + $0x20] sm:$0xe] }
  0x7e   : > { %v675_v51 = vld [vmem:[#allocation2 + $0x44] sm:$0x1]  ;;  %v955_v58 = vshll.u32 %v859_v48, 16  ;;  %v1023_v54 = vrot.slane %v859_v48, 5  ;;  %2595 = vmatprep.subr.bf16.mxu1 %v3417_v46  ;;  %v772_v18 = vrot.slane %v770_v53, 5  ;;  %v782_v10 = vrot.slane %v781_v12, 4 }
  0x7f   : > { %v842_v6 = vrot.slane %v675_v51, 5  ;;  %2572 = vmatpush3.bf16.msra.mxu0 %v3351_v36  ;;  %v972_v4 = vsel %vm2936_vm11, %v967_v3, %v971_v23  ;;  %v784_v47 = vshll.u32 %v675_v51, 16  ;;  %v1015_v29 = vrot.slane %v3319_v28, 5 }
  0x80   : > { %2573 = vmatprep.subr.bf16.mxu0 %v3362_v63  ;;  %v957_v1 = vrot.slane %v955_v58, 5  ;;  %v773_v20 = vsel %vm2936_vm11, %v768_v7, %v772_v18  ;;  %v2270_v45 = vrot.slane %v978_v42, 9  ;;  %v1019_v28 = vrot.slane %v3338_v8, 5 }
  0x81   : > { %v843_v13 = vsel %vm2906_vm8, %v2264_v43, %v842_v6  ;;  %2603 = vmatpush3.bf16.msra.mxu1 %v3417_v46  ;;  %v786_v24 = vrot.slane %v784_v47, 5  ;;  %v1016_v27 = vsel %vm2906_vm8, %v2269_v25, %v1015_v29  ;;  %v2271_v16 = vrot.slane %v979_v59, 9 }
  0x82   : > { %v2296_v36 = vcombine.low %v839_v38, %v843_v13  ;;  %1952 = vmatmul.mubr.bf16.gmra.mrb[24].mxu0 %v2291_v5  ;;  %v958_v19 = vsel %vm2936_vm11, %v953_v31, %v957_v1  ;;  %2596 = vmatprep.subr.bf16.mxu1 %v3427_v40  ;;  %v2272_v35 = vrot.slane %v980_v52, 9  ;;  %v2265_v60 = vrot.slane %v973_v34, 9  ;;  %v976_v5 = vld [vmem:[#allocation2 + $0x28] sm:$0xe] }
  0x83   : > { %v2304_v32 = vcombine.low %v958_v19, %v972_v4  ;;  %2574 = vmatpush3.bf16.msra.mxu0 %v3362_v63  ;;  %v787_v2 = vsel %vm2936_vm11, %v782_v10, %v786_v24  ;;  %v1020_v8 = vsel %vm2906_vm8, %v2270_v45, %v1019_v28  ;;  %v999_v50 = vrot.slane %v3190_v44, 5 }
  0x84   : > { %1959 = vmatprep.mubr.bf16.mxu0 %v2296_v36  ;;  %2575 = vmatprep.subr.bf16.mxu0 %v3403_v56  ;;  %v2307_v62 = vcombine.low %v1016_v27, %v1020_v8  ;;  %v2266_v0 = vrot.slane %v974_v37, 9  ;;  %v1003_v55 = vrot.slane %v3205_v61, 5  ;;  %v1007_v14 = vrot.slane %v3267_v26, 5 }
  0x85   : > { %2024 = vmatprep.mubr.bf16.mxu1 %v2304_v32  ;;  %2604 = vmatpush3.bf16.msra.mxu1 %v3427_v40  ;;  %v1000_v63 = vsel %vm2906_vm8, %v2265_v60, %v999_v50  ;;  %v1011_v17 = vrot.slane %v3281_v11, 5  ;;  %v2292_v44 = vcombine.low %v773_v20, %v787_v2  ;;  %v1024_v22 = vsel %vm2906_vm8, %v2271_v16, %v1023_v54 }
  0x86   : > { %2025 = vmatmul.mubr.bf16.gmra.mrb[28].mxu1 %v2300_v15  ;;  %v1028_v23 = vsel %vm2906_vm8, %v2272_v35, %v1027_v41  ;;  %v1004_v61 = vsel %vm2906_vm8, %v2266_v0, %v1003_v55  ;;  %v2267_v33 = vrot.slane %v975_v30, 9  ;;  %v2268_v26 = vrot.slane %v976_v5, 9 }
  0x87   : > { %2576 = vmatpush3.bf16.msra.mxu0 %v3403_v56  ;;  %2585 = vmatprep.mubr.bf16.mxu1 %v2307_v62  ;;  %v2305_v11 = vcombine.low %v1000_v63, %v1004_v61  ;;  %v2308_v49 = vcombine.low %v1024_v22, %v1028_v23 }
  0x88   : > { %2577 = vmatprep.subr.bf16.mxu0 %v3417_v46  ;;  %v1008_v56 = vsel %vm2906_vm8, %v2267_v33, %v1007_v14  ;;  %v1012_v39 = vsel %vm2906_vm8, %v2268_v26, %v1011_v17 }
  0x89   : > { %v2306_v41 = vcombine.low %v1008_v56, %v1012_v39 }
  0x8a   : > { %1960 = vmatmul.mubr.bf16.gmra.mrb[28].mxu0 %v2292_v44 }
  0x8b   : > { %2578 = vmatpush3.bf16.msra.mxu0 %v3417_v46  ;;  %2581 = vmatprep.mubr.bf16.mxu0 %v2305_v11 }
  0x8c   : > { %2579 = vmatprep.subr.bf16.mxu0 %v3427_v40 }
  0x8e   : > { %2586 = vmatmul.mubr.bf16.vlgmr.msra.gmra.mrb[32].mxu1 %v2308_v49 }
  0x8f   : > { %2580 = vmatpush3.bf16.msra.mxu0 %v3427_v40 }
  0x92   : > { %2582 = vmatmul.mubr.bf16.vlgmr.msra.gmra.mrb[32].mxu0 %v2306_v41 }
 0x104   : > { %v2449_v57 = vpop.f32.mrb[0].mxu1 }
 0x105   : > { %v2450_v43 = vpop.f32.mrb[1].mxu1 }
 0x106   : > { %v2451_v9 = vadd.f32 %v2450_v43, %v2449_v57  ;;  %v2452_v31 = vpop.f32.mrb[2].mxu1 }
 0x107   : > { %v2453_v53 = vpop.f32.mrb[3].mxu1 }
 0x108   : > { %v2454_v46 = vadd.f32 %v2453_v53, %v2452_v31 }
 0x10c   : > { %v2409_v12 = vpop.f32.mrb[0].mxu0 }
 0x10d   : > { %v2410_v42 = vpop.f32.mrb[1].mxu0 }
 0x10e   : > { %v2411_v25 = vadd.f32 %v2410_v42, %v2409_v12  ;;  %v2412_v48 = vpop.f32.mrb[2].mxu0 }
 0x10f   : > { %v2413_v3 = vpop.f32.mrb[3].mxu0  ;;  %v2455_v38 = vpop.f32.mrb[4].mxu1 }
 0x110   : > { %v1873_v21 = vadd.f32 %v2451_v9, %v2411_v25  ;;  %v2414_v15 = vadd.f32 %v2413_v3, %v2412_v48  ;;  %v2456_v7 = vpop.f32.mrb[5].mxu1 }
 0x111   : > { %v2457_v59 = vadd.f32 %v2456_v7, %v2455_v38  ;;  %v2458_v58 = vpop.f32.mrb[6].mxu1 }
 0x112   : > { %v1876_v51 = vadd.f32 %v2454_v46, %v2414_v15  ;;  %v2459_v40 = vpop.f32.mrb[7].mxu1 }
 0x113   : > { %v2460_v54 = vadd.f32 %v2459_v40, %v2458_v58 }
 0x118   : > { %v2415_v6 = vpop.f32.mrb[4].mxu0 }
 0x119   : > { %v2416_v18 = vpop.f32.mrb[5].mxu0 }
 0x11a   : > { %v2417_v52 = vadd.f32 %v2416_v18, %v2415_v6  ;;  %v2418_v4 = vpop.f32.mrb[6].mxu0 }
 0x11b   : > { %v2419_v10 = vpop.f32.mrb[7].mxu0 }
 0x11c   : > { %v1881_v47 = vadd.f32 %v2457_v59, %v2417_v52  ;;  %v2420_v29 = vadd.f32 %v2419_v10, %v2418_v4 }
 0x11e   : > { %v3483_v34 = vadd.f32 %v2460_v54, %v2420_v29 }
 0x124   : > { %v2461_v1 = vpop.f32.mrb[8].mxu1 }
 0x125   : > { %v2462_v13 = vpop.f32.mrb[9].mxu1 }
 0x126   : > { %v2463_v20 = vadd.f32 %v2462_v13, %v2461_v1  ;;  %v2464_v45 = vpop.f32.mrb[10].mxu1 }
 0x127   : > { %v2465_v36 = vpop.f32.mrb[11].mxu1 }
 0x128   : > { %v2466_v24 = vadd.f32 %v2465_v36, %v2464_v45 }
 0x12b   : > { %v2421_v27 = vpop.f32.mrb[8].mxu0 }
 0x12c   : > { %v2422_v28 = vpop.f32.mrb[9].mxu0 }
 0x12d   : > { %v2423_v19 = vadd.f32 %v2422_v28, %v2421_v27  ;;  %v2424_v16 = vpop.f32.mrb[10].mxu0 }
 0x12e   : > { %v2425_v35 = vpop.f32.mrb[11].mxu0 }
 0x12f   : > { %v1889_v37 = vadd.f32 %v2463_v20, %v2423_v19  ;;  %v2426_v60 = vadd.f32 %v2425_v35, %v2424_v16 }
 0x131   : > { %v1892_v32 = vadd.f32 %v2466_v24, %v2426_v60 }
 0x133   : > { %v2467_v2 = vpop.f32.mrb[12].mxu1 }
 0x134   : > { %v2468_v8 = vpop.f32.mrb[13].mxu1 }
 0x135   : > { %v2469_v50 = vadd.f32 %v2468_v8, %v2467_v2  ;;  %v2470_v62 = vpop.f32.mrb[14].mxu1 }
 0x136   : > { %v2471_v30 = vpop.f32.mrb[15].mxu1 }
 0x137   : > { %v2472_v5 = vadd.f32 %v2471_v30, %v2470_v62 }
 0x13b   : > { %v2529_v63 = vpop.f32.mrb[16].mxu1 }
 0x13c   : > { %v2530_v0 = vpop.f32.mrb[17].mxu1 }
 0x13d   : > { %v2427_v55 = vpop.f32.mrb[12].mxu0  ;;  %v2531_v14 = vadd.f32 %v2530_v0, %v2529_v63  ;;  %v2532_v17 = vpop.f32.mrb[18].mxu1 }
 0x13e   : > { %v2428_v44 = vpop.f32.mrb[13].mxu0  ;;  %v2533_v22 = vpop.f32.mrb[19].mxu1 }
 0x13f   : > { %v2429_v23 = vadd.f32 %v2428_v44, %v2427_v55  ;;  %v2430_v61 = vpop.f32.mrb[14].mxu0  ;;  %v2534_v33 = vadd.f32 %v2533_v22, %v2532_v17 }
 0x140   : > { %v2431_v26 = vpop.f32.mrb[15].mxu0 }
 0x141   : > { %v1897_v11 = vadd.f32 %v2469_v50, %v2429_v23  ;;  %v2432_v49 = vadd.f32 %v2431_v26, %v2430_v61 }
 0x143   : > { %v1900_v56 = vadd.f32 %v2472_v5, %v2432_v49 }
 0x145   : > { %v2489_v39 = vpop.f32.mrb[16].mxu0  ;;  %v2535_v41 = vpop.f32.mrb[20].mxu1 }
 0x146   : > { %v2490_v57 = vpop.f32.mrb[17].mxu0  ;;  %v2536_v43 = vpop.f32.mrb[21].mxu1 }
 0x147   : > { %v2491_v9 = vadd.f32 %v2490_v57, %v2489_v39  ;;  %v2492_v31 = vpop.f32.mrb[18].mxu0  ;;  %v2537_v53 = vadd.f32 %v2536_v43, %v2535_v41  ;;  %v2538_v46 = vpop.f32.mrb[22].mxu1 }
 0x148   : > { %v2493_v12 = vpop.f32.mrb[19].mxu0  ;;  %v2539_v42 = vpop.f32.mrb[23].mxu1 }
 0x149   : > { %v1938_v25 = vadd.f32 %v2491_v9, %v1873_v21  ;;  %v2494_v48 = vadd.f32 %v2493_v12, %v2492_v31  ;;  %v2540_v3 = vadd.f32 %v2539_v42, %v2538_v46 }
 0x14b   : > { %v1941_v15 = vadd.f32 %v2494_v48, %v1876_v51  ;;  %v2003_v38 = vadd.f32 %v2531_v14, %v1938_v25 }
 0x14d   : > { %v2495_v7 = vpop.f32.mrb[20].mxu0  ;;  %v3485_v59 = vadd.f32 %v2534_v33, %v1941_v15 }
 0x14e   : > { %v2496_v58 = vpop.f32.mrb[21].mxu0  ;;  %v2541_v40 = vpop.f32.mrb[24].mxu1 }
 0x14f   : > { %v2497_v54 = vadd.f32 %v2496_v58, %v2495_v7  ;;  %v2498_v6 = vpop.f32.mrb[22].mxu0  ;;  %v2542_v18 = vpop.f32.mrb[25].mxu1 }
 0x150   : > { %v2499_v52 = vpop.f32.mrb[23].mxu0  ;;  %v2543_v4 = vadd.f32 %v2542_v18, %v2541_v40  ;;  %v2544_v10 = vpop.f32.mrb[26].mxu1 }
 0x151   : > { %v1946_v29 = vadd.f32 %v2497_v54, %v1881_v47  ;;  %v2500_v1 = vadd.f32 %v2499_v52, %v2498_v6  ;;  %v2545_v13 = vpop.f32.mrb[27].mxu1 }
 0x152   : > { %v2546_v20 = vadd.f32 %v2545_v13, %v2544_v10 }
 0x153   : > { %v1949_v21 = vadd.f32 %v2500_v1, %v3483_v34  ;;  %v2011_v45 = vadd.f32 %v2537_v53, %v1946_v29 }
 0x155   : > { %v2501_v51 = vpop.f32.mrb[24].mxu0  ;;  %v2014_v36 = vadd.f32 %v2540_v3, %v1949_v21 }
 0x156   : > { %v2502_v24 = vpop.f32.mrb[25].mxu0 }
 0x157   : > { %v2503_v27 = vadd.f32 %v2502_v24, %v2501_v51  ;;  %v2504_v28 = vpop.f32.mrb[26].mxu0 }
 0x158   : > { %v2505_v19 = vpop.f32.mrb[27].mxu0 }
 0x159   : > { %v1954_v16 = vadd.f32 %v2503_v27, %v1889_v37  ;;  %v2506_v35 = vadd.f32 %v2505_v19, %v2504_v28  ;;  %v2547_v60 = vpop.f32.mrb[28].mxu1 }
 0x15a   : > { %v2548_v2 = vpop.f32.mrb[29].mxu1 }
 0x15b   : > { %v1957_v8 = vadd.f32 %v2506_v35, %v1892_v32  ;;  %v2549_v50 = vadd.f32 %v2548_v2, %v2547_v60  ;;  %v2550_v47 = vpop.f32.mrb[30].mxu1  ;;  %v2019_v62 = vadd.f32 %v2543_v4, %v1954_v16 }
 0x15c   : > { %v2551_v30 = vpop.f32.mrb[31].mxu1 }
 0x15d   : > { %v2507_v5 = vpop.f32.mrb[28].mxu0  ;;  %v2552_v63 = vadd.f32 %v2551_v30, %v2550_v47  ;;  %v2022_v34 = vadd.f32 %v2546_v20, %v1957_v8 }
 0x15e   : > { %v2508_v0 = vpop.f32.mrb[29].mxu0 }
 0x15f   : > { %v2509_v55 = vadd.f32 %v2508_v0, %v2507_v5  ;;  %v2510_v14 = vpop.f32.mrb[30].mxu0 }
 0x160   : > { %v2511_v17 = vpop.f32.mrb[31].mxu0 }
 0x161   : > { %v1962_v44 = vadd.f32 %v2509_v55, %v1897_v11  ;;  %v2587_v22 = vpop.f32.mrb[32].mxu1  ;;  %v2512_v23 = vadd.f32 %v2511_v17, %v2510_v14 }
 0x162   : > { %v2083_v37 = vpop.f32.mrb[33].mxu1 }
 0x163   : > { %v2027_v32 = vadd.f32 %v2549_v50, %v1962_v44  ;;  %v2084_v61 = vadd.f32 %v2083_v37, %v2019_v62  ;;  %v1965_v33 = vadd.f32 %v2512_v23, %v1900_v56  ;;  %v2588_v26 = vpop.f32.mrb[34].mxu1 }
 0x164   : > { %v2086_v49 = vpop.f32.mrb[35].mxu1 }
 0x165   : > { %v2092_v39 = vadd.f32 %v2587_v22, %v2027_v32  ;;  %2102 = vst [vmem:[%s231_s17 + $0x20] sm:$0xff] %v2084_v61  ;;  %v2030_v41 = vadd.f32 %v2552_v63, %v1965_v33  ;;  %v2087_v57 = vadd.f32 %v2086_v49, %v2022_v34  ;;  %v2583_v43 = vpop.f32.mrb[32].mxu0 }
 0x166   : > { %v2076_v9 = vadd.f32 %v2583_v43, %v2011_v45  ;;  %v2067_v11 = vpop.f32.mrb[33].mxu0 }
 0x167   : > { %2104 = vst [vmem:[%s231_s17 + $0x30] sm:$0xff] %v2092_v39  ;;  %v2095_v31 = vadd.f32 %v2588_v26, %v2030_v41  ;;  %2103 = vst [vmem:[%s231_s17 + $0x28] sm:$0xff] %v2087_v57  ;;  %v2068_v53 = vadd.f32 %v2067_v11, %v2003_v38  ;;  %v2584_v46 = vpop.f32.mrb[34].mxu0  ;;  %v2123_v38 = vmul.f32 %v2084_v61, %v2084_v61 }
 0x168   : > { %2100 = vst [vmem:[%s231_s17 + $0x10] sm:$0xff] %v2076_v9  ;;  %v2079_v12 = vadd.f32 %v2584_v46, %v2014_v36  ;;  %v2070_v42 = vpop.f32.mrb[35].mxu0  ;;  %v2121_v15 = vmul.f32 %v2076_v9, %v2076_v9  ;;  %v2124_v4 = vmul.f32 %v2087_v57, %v2087_v57  ;;  %v2125_v1 = vmul.f32 %v2092_v39, %v2092_v39 }
 0x169   : > { %2105 = vst [vmem:[%s231_s17 + $0x38] sm:$0xff] %v2095_v31  ;;  %2098 = vst [vmem:[%s231_s17] sm:$0xff] %v2068_v53  ;;  %v2071_v56 = vadd.f32 %v2070_v42, %v3485_v59  ;;  %v2119_v25 = vmul.f32 %v2068_v53, %v2068_v53  ;;  %v2126_v20 = vmul.f32 %v2095_v31, %v2095_v31 }
 0x16a   : > { %2101 = vst [vmem:[%s231_s17 + $0x18] sm:$0xff] %v2079_v12  ;;  %v2122_v40 = vmul.f32 %v2079_v12, %v2079_v12 }
 0x16b   : > { %2099 = vst [vmem:[%s231_s17 + $0x8] sm:$0xff] %v2071_v56  ;;  %v2106_v48 = vadd.f32 %v2071_v56, %v2068_v53  ;;  %v2120_v3 = vmul.f32 %v2071_v56, %v2071_v56 }
 0x16d   : > { %v2107_v7 = vadd.f32 %v2106_v48, %v2076_v9  ;;  %v2127_v58 = vadd.f32 %v2120_v3, %v2119_v25 }
 0x16f   : > { %v2108_v54 = vadd.f32 %v2107_v7, %v2079_v12  ;;  %v2128_v6 = vadd.f32 %v2127_v58, %v2121_v15 }
 0x171   : > { %v2109_v18 = vadd.f32 %v2108_v54, %v2084_v61  ;;  %v2129_v52 = vadd.f32 %v2128_v6, %v2122_v40 }
 0x173   : > { %v2110_v10 = vadd.f32 %v2109_v18, %v2087_v57  ;;  %v2130_v29 = vadd.f32 %v2129_v52, %v2123_v38 }
 0x175   : > { %v2111_v59 = vadd.f32 %v2110_v10, %v2092_v39  ;;  %v2131_v13 = vadd.f32 %v2130_v29, %v2124_v4 }
 0x177   : > { %v2112_v21 = vadd.f32 %v2111_v59, %v2095_v31  ;;  %v2132_v45 = vadd.f32 %v2131_v13, %v2125_v1 }
 0x179   : > { %v2113_v51 = vrot.slane %v2112_v21, 4  ;;  %v2133_v36 = vadd.f32 %v2132_v45, %v2126_v20 }
 0x17b   : > { %v2114_v24 = vadd.f32 %v2113_v51, %v2112_v21  ;;  %v2134_v27 = vrot.slane %v2133_v36, 4 }
 0x17d   : > { %v2115_v28 = vrot.slane %v2114_v24, 2  ;;  %v2135_v19 = vadd.f32 %v2134_v27, %v2133_v36 }
 0x17f   : > { %v2116_v16 = vadd.f32 %v2115_v28, %v2114_v24  ;;  %v2136_v35 = vrot.slane %v2135_v19, 2 }
 0x181   : > { %v2117_v60 = vrot.slane %v2116_v16, 1  ;;  %v2137_v2 = vadd.f32 %v2136_v35, %v2135_v19 }
 0x183   : > { %v2138_v8 = vrot.slane %v2137_v2, 1  ;;  %v2118_v50 = vadd.f32 %v2117_v60, %v2116_v16 }
 0x185   : > { %v2139_v47 = vadd.f32 %v2138_v8, %v2137_v2 }
 0x187   : > { %v2141_v62 = vsel %vm422_vm3, %v2118_v50, %v2139_v47 }
 0x188   : > { %2142 = vst [vmem:[%s235_s21] sm:$0x3] %v2141_v62 }
 0x189 PF: > { %s16_s18 = sadd.s32 1, %s2704_s18  }
 0x18a   : > { %p13_p4 = scmp.ge.s32.totalorder %s16_s18, 4  }
 0x18c   :  { %15 = sbr.rel (!%p13_p4) target bundleno = 1 (0x1), region = 80 }

</bundles_post_ra>
